<compile_context>
chip_gen: v5e
topology: v5e:2x2
jax: 0.10.0
libtpu: 0.0.40
codegen_flags: <defaults>
</compile_context>

<pallas_src>
import jax
import jax.numpy as jnp
import numpy as np
from jax.experimental import pallas as pl
from jax.experimental.pallas import tpu as pltpu

N, H, W = 2, 16, 16          # batch, spatial
C_MID = 16                   # conv channel width (conv1 real Cin = 1)
N_CLASSES = 10
HW = H * W

_TAPS = tuple((dy, dx) for dy in range(3) for dx in range(3))   # k = dy*3 + dx


# ---------------------------------------------------------------------------
# Fused kernel: `images_per_step` images per grid step, channel-major.
# ---------------------------------------------------------------------------
def fused_smallcnn_kernel(x_ref, mask_ref, w1_ref, b1_ref, w2_ref, b2_ref,
                          w3_ref, b3_ref, wfc_ref, bfc_ref, o_ref, patch_ref):
    C = C_MID
    L = x_ref.shape[-1]              # images_per_step * H * W (static)
    ips = L // HW

    def tap_shift(v, k):
        # y[:, j] = v[:, (j + s) mod L]; out-of-image taps are zeroed by the
        # constant mask.  Wrapped lanes (incl. cross-image wrap) are always
        # masked boundary positions, so the SAME padding is exact.
        dy, dx = _TAPS[k]
        s = (dy - 1) * W + (dx - 1)
        rolled = v if s % L == 0 else pltpu.roll(v, shift=(-s) % L, axis=1)
        return rolled * mask_ref[pl.ds(k, 1), :]

    # ---- conv1 (Cin = 1): nine rank-1 accumulations on the VPU --------------
    x_row = x_ref[0]                                        # (1, L)
    acc = jnp.zeros((C, L), jnp.float32)
    for k in range(9):
        acc = acc + w1_ref[:, pl.ds(k, 1)] * tap_shift(x_row, k)
    h = jnp.maximum(acc + b1_ref[...], 0.0)                 # (C, L)

    # ---- conv2 / conv3: im2col into (9*C, L) scratch + one MXU matmul each --
    def conv3x3_relu(act, w_ref, b_ref):
        for k in range(9):
            # sublane offset k*16 (8-aligned), full lane width -> unmasked vst.
            patch_ref[pl.ds(k * C, C), :] = tap_shift(act, k)
        y = jnp.dot(w_ref[...], patch_ref[...],             # (C,9C) x (9C,L)
                    preferred_element_type=jnp.float32)
        return jnp.maximum(y + b_ref[...], 0.0)             # (C, L)

    h = conv3x3_relu(h, w2_ref, b2_ref)
    h = conv3x3_relu(h, w3_ref, b3_ref)

    # ---- fc folded before the pool (linear ops commute), per-image lane mean.
    z = jnp.dot(wfc_ref[...], h, preferred_element_type=jnp.float32)   # (10, L)
    cols = [jnp.sum(z[:, i * HW:(i + 1) * HW], axis=1, keepdims=True) * (1.0 / HW)
            + bfc_ref[...] for i in range(ips)]
    o_ref[0] = cols[0] if ips == 1 else jnp.concatenate(cols, axis=1)   # (10, ips)


# ---------------------------------------------------------------------------
# Wrapper: layout prep (trace-time only) + pallas_call plumbing.
# ---------------------------------------------------------------------------
def _conv_w_to_mat(w_oihw):
    # PyTorch OIHW -> (O, KH, KW, I) -> matmul-ready (O, 9*I); column k*I + i
    # lines up with im2col row k*I + i (tap-major, channel-minor).
    o, i = w_oihw.shape[0], w_oihw.shape[1]
    return jnp.transpose(w_oihw, (0, 2, 3, 1)).reshape(o, 9 * i)


def _boundary_mask(ips):
    # mask[k, img*HW + h*W + w] = 1 iff tap k of (h, w) lands inside the image.
    m = np.zeros((9, HW), np.float32)
    for k, (dy, dx) in enumerate(_TAPS):
        for h in range(H):
            for w in range(W):
                oh, ow = h + dy - 1, w + dx - 1
                m[k, h * W + w] = float(0 <= oh < H and 0 <= ow < W)
    return jnp.asarray(np.tile(m, (1, ips)))                # (9, ips*HW)


def _default_images_per_step(n):
    kind = ""
    try:
        kind = jax.devices()[0].device_kind.lower()
    except Exception:
        pass
    two_tc = ("v7" in kind) or ("7x" in kind)               # 2 TensorCores / chip
    target = max(1, n // 2) if (two_tc and n >= 2) else n   # 1 chunk per TC vs whole batch
    cap = max(1, (8 * 1024 * 1024) // (9 * C_MID * HW * 4)) # patch scratch <= ~8 MiB
    ips = min(target, cap)
    while n % ips:                                          # need whole grid steps
        ips -= 1
    return ips


def small_cnn_forward(x_nchw, params, images_per_step=None):
    n = x_nchw.shape[0]
    ips = images_per_step or _default_images_per_step(n)
    assert n % ips == 0
    steps = n // ips
    L = ips * HW

    # NCHW (n,1,H,W) -> one single-channel lane row per grid step.
    x = x_nchw.astype(jnp.float32).reshape(steps, 1, L)

    mask = _boundary_mask(ips)
    w1 = _conv_w_to_mat(params["w1"])                       # (16, 9)
    w2 = _conv_w_to_mat(params["w2"])                       # (16, 144)
    w3 = _conv_w_to_mat(params["w3"])                       # (16, 144)
    b1 = params["b1"].reshape(C_MID, 1)
    b2 = params["b2"].reshape(C_MID, 1)
    b3 = params["b3"].reshape(C_MID, 1)
    wfc = params["wfc"]                                     # (10, 16) native layout
    bfc = params["bfc"].reshape(N_CLASSES, 1)

    full = lambda s: (0, 0)
    out = pl.pallas_call(
        fused_smallcnn_kernel,
        out_shape=jax.ShapeDtypeStruct((steps, N_CLASSES, ips), jnp.float32),
        grid=(steps,),
        in_specs=[
            pl.BlockSpec((1, 1, L), lambda s: (s, 0, 0)),   # x (per grid step)
            pl.BlockSpec((9, L), full),                     # boundary mask
            pl.BlockSpec((C_MID, 9), full),                 # w1
            pl.BlockSpec((C_MID, 1), full),                 # b1
            pl.BlockSpec((C_MID, 9 * C_MID), full),         # w2
            pl.BlockSpec((C_MID, 1), full),                 # b2
            pl.BlockSpec((C_MID, 9 * C_MID), full),         # w3
            pl.BlockSpec((C_MID, 1), full),                 # b3
            pl.BlockSpec((N_CLASSES, C_MID), full),         # wfc
            pl.BlockSpec((N_CLASSES, 1), full),             # bfc
        ],
        out_specs=pl.BlockSpec((1, N_CLASSES, ips), lambda s: (s, 0, 0)),
        scratch_shapes=[pltpu.VMEM((9 * C_MID, L), jnp.float32)],   # im2col buf
        compiler_params=pltpu.CompilerParams(
            dimension_semantics=("parallel",)),
    )(x, mask, w1, b1, w2, b2, w3, b3, wfc, bfc)

    # (steps, 10, ips) -> (n, 10), image order preserved.
    return jnp.transpose(out, (0, 2, 1)).reshape(n, N_CLASSES)


# ---------------------------------------------------------------------------
# Deterministic params (PyTorch-layout shapes) + pure-JAX reference.
# ---------------------------------------------------------------------------
def init_params(key):
    ks = jax.random.split(key, 8)
    return {
        "w1": 0.1 * jax.random.normal(ks[0], (C_MID, 1, 3, 3), jnp.float32),
        "b1": 0.05 * jax.random.normal(ks[1], (C_MID,), jnp.float32),
        "w2": 0.1 * jax.random.normal(ks[2], (C_MID, C_MID, 3, 3), jnp.float32),
        "b2": 0.05 * jax.random.normal(ks[3], (C_MID,), jnp.float32),
        "w3": 0.1 * jax.random.normal(ks[4], (C_MID, C_MID, 3, 3), jnp.float32),
        "b3": 0.05 * jax.random.normal(ks[5], (C_MID,), jnp.float32),
        "wfc": 0.1 * jax.random.normal(ks[6], (N_CLASSES, C_MID), jnp.float32),
        "bfc": 0.05 * jax.random.normal(ks[7], (N_CLASSES,), jnp.float32),
    }


def reference_forward(x_nchw, params):
    def conv(x, w, b):
        y = jax.lax.conv_general_dilated(
            x, w, window_strides=(1, 1), padding="SAME",
            dimension_numbers=("NCHW", "OIHW", "NCHW"))
        return jnp.maximum(y + b[None, :, None, None], 0.0)
    h = conv(x_nchw, params["w1"], params["b1"])
    h = conv(h, params["w2"], params["b2"])
    h = conv(h, params["w3"], params["b3"])
    pooled = jnp.mean(h, axis=(2, 3))                 # AdaptiveAvgPool2d((1,1))
    return pooled @ params["wfc"].T + params["bfc"]   # fc 16 -> 10


if __name__ == "__main__":
    key = jax.random.PRNGKey(0)
    kx, kp = jax.random.split(key)
    x = jax.random.normal(kx, (N, 1, H, W), jnp.float32)   # PyTorch NCHW input
    params = init_params(kp)

    out = jax.jit(small_cnn_forward)(x, params)
    out = jax.block_until_ready(out)

    ref = reference_forward(x, params)
    assert out.shape == (N, N_CLASSES)
    np.testing.assert_allclose(np.asarray(out), np.asarray(ref),
                               rtol=1e-4, atol=1e-4)
    print("KERNEL_OK")
</pallas_src>

<mosaic_0001>
module attributes {stable_mosaic.version = 11 : i64} {
  func.func @fused_smallcnn_kernel(%arg0: i32, %arg1: memref<1x1x512xf32, #tpu.memory_space<vmem>>, %arg2: memref<9x512xf32, #tpu.memory_space<vmem>>, %arg3: memref<16x9xf32, #tpu.memory_space<vmem>>, %arg4: memref<16x1xf32, #tpu.memory_space<vmem>>, %arg5: memref<16x144xf32, #tpu.memory_space<vmem>>, %arg6: memref<16x1xf32, #tpu.memory_space<vmem>>, %arg7: memref<16x144xf32, #tpu.memory_space<vmem>>, %arg8: memref<16x1xf32, #tpu.memory_space<vmem>>, %arg9: memref<10x16xf32, #tpu.memory_space<vmem>>, %arg10: memref<10x1xf32, #tpu.memory_space<vmem>>, %arg11: memref<1x10x2xf32, #tpu.memory_space<vmem>>, %arg12: memref<144x512xf32, #tpu.memory_space<vmem>>) attributes {dimension_semantics = [#tpu.dimension_semantics<parallel>], iteration_bounds = array<i64: 1>, scalar_prefetch = 0 : i64, scratch_operands = 1 : i64, tpu.core_type = #tpu.core_type<tc>, window_params = [{transform_indices = @transform_0, window_bounds = array<i64: 1, 1, 512>}, {pipeline_mode = #tpu.pipeline_mode<synchronous>, transform_indices = @transform_1, window_bounds = array<i64: 9, 512>}, {pipeline_mode = #tpu.pipeline_mode<synchronous>, transform_indices = @transform_2, window_bounds = array<i64: 16, 9>}, {pipeline_mode = #tpu.pipeline_mode<synchronous>, transform_indices = @transform_3, window_bounds = array<i64: 16, 1>}, {pipeline_mode = #tpu.pipeline_mode<synchronous>, transform_indices = @transform_4, window_bounds = array<i64: 16, 144>}, {pipeline_mode = #tpu.pipeline_mode<synchronous>, transform_indices = @transform_5, window_bounds = array<i64: 16, 1>}, {pipeline_mode = #tpu.pipeline_mode<synchronous>, transform_indices = @transform_6, window_bounds = array<i64: 16, 144>}, {pipeline_mode = #tpu.pipeline_mode<synchronous>, transform_indices = @transform_7, window_bounds = array<i64: 16, 1>}, {pipeline_mode = #tpu.pipeline_mode<synchronous>, transform_indices = @transform_8, window_bounds = array<i64: 10, 16>}, {pipeline_mode = #tpu.pipeline_mode<synchronous>, transform_indices = @transform_9, window_bounds = array<i64: 10, 1>}, {transform_indices = @transform_10, window_bounds = array<i64: 1, 10, 2>}]} {
    %c0 = arith.constant 0 : index
    %c0_0 = arith.constant 0 : index
    %c0_1 = arith.constant 0 : index
    %0 = vector.load %arg1[%c0, %c0_0, %c0_1] : memref<1x1x512xf32, #tpu.memory_space<vmem>>, vector<1x1x512xf32>
    %1 = vector.shape_cast %0 : vector<1x1x512xf32> to vector<1x512xf32>
    %cst = arith.constant 0.000000e+00 : f32
    %2 = vector.broadcast %cst : f32 to vector<16x512xf32>
    %c0_2 = arith.constant 0 : index
    %c0_3 = arith.constant 0 : index
    %3 = vector.load %arg3[%c0_2, %c0_3] : memref<16x9xf32, #tpu.memory_space<vmem>>, vector<16x1xf32>
    %c17_i32 = arith.constant 17 : i32
    %4 = tpu.dynamic_rotate %1 by %c17_i32 dim 1 : vector<1x512xf32>, i32 -> vector<1x512xf32>
    %c0_4 = arith.constant 0 : index
    %c0_5 = arith.constant 0 : index
    %5 = vector.load %arg2[%c0_4, %c0_5] : memref<9x512xf32, #tpu.memory_space<vmem>>, vector<1x512xf32>
    %6 = arith.mulf %4, %5 : vector<1x512xf32>
    %7 = vector.broadcast %3 : vector<16x1xf32> to vector<16x512xf32>
    %8 = vector.broadcast %6 : vector<1x512xf32> to vector<16x512xf32>
    %9 = arith.mulf %7, %8 : vector<16x512xf32>
    %10 = arith.addf %2, %9 : vector<16x512xf32>
    %c0_6 = arith.constant 0 : index
    %c1 = arith.constant 1 : index
    %11 = vector.load %arg3[%c0_6, %c1] : memref<16x9xf32, #tpu.memory_space<vmem>>, vector<16x1xf32>
    %c16_i32 = arith.constant 16 : i32
    %12 = tpu.dynamic_rotate %1 by %c16_i32 dim 1 : vector<1x512xf32>, i32 -> vector<1x512xf32>
    %c1_7 = arith.constant 1 : index
    %c0_8 = arith.constant 0 : index
    %13 = vector.load %arg2[%c1_7, %c0_8] : memref<9x512xf32, #tpu.memory_space<vmem>>, vector<1x512xf32>
    %14 = arith.mulf %12, %13 : vector<1x512xf32>
    %15 = vector.broadcast %11 : vector<16x1xf32> to vector<16x512xf32>
    %16 = vector.broadcast %14 : vector<1x512xf32> to vector<16x512xf32>
    %17 = arith.mulf %15, %16 : vector<16x512xf32>
    %18 = arith.addf %10, %17 : vector<16x512xf32>
    %c0_9 = arith.constant 0 : index
    %c2 = arith.constant 2 : index
    %19 = vector.load %arg3[%c0_9, %c2] : memref<16x9xf32, #tpu.memory_space<vmem>>, vector<16x1xf32>
    %c15_i32 = arith.constant 15 : i32
    %20 = tpu.dynamic_rotate %1 by %c15_i32 dim 1 : vector<1x512xf32>, i32 -> vector<1x512xf32>
    %c2_10 = arith.constant 2 : index
    %c0_11 = arith.constant 0 : index
    %21 = vector.load %arg2[%c2_10, %c0_11] : memref<9x512xf32, #tpu.memory_space<vmem>>, vector<1x512xf32>
    %22 = arith.mulf %20, %21 : vector<1x512xf32>
    %23 = vector.broadcast %19 : vector<16x1xf32> to vector<16x512xf32>
    %24 = vector.broadcast %22 : vector<1x512xf32> to vector<16x512xf32>
    %25 = arith.mulf %23, %24 : vector<16x512xf32>
    %26 = arith.addf %18, %25 : vector<16x512xf32>
    %c0_12 = arith.constant 0 : index
    %c3 = arith.constant 3 : index
    %27 = vector.load %arg3[%c0_12, %c3] : memref<16x9xf32, #tpu.memory_space<vmem>>, vector<16x1xf32>
    %c1_i32 = arith.constant 1 : i32
    %28 = tpu.dynamic_rotate %1 by %c1_i32 dim 1 : vector<1x512xf32>, i32 -> vector<1x512xf32>
    %c3_13 = arith.constant 3 : index
    %c0_14 = arith.constant 0 : index
    %29 = vector.load %arg2[%c3_13, %c0_14] : memref<9x512xf32, #tpu.memory_space<vmem>>, vector<1x512xf32>
    %30 = arith.mulf %28, %29 : vector<1x512xf32>
    %31 = vector.broadcast %27 : vector<16x1xf32> to vector<16x512xf32>
    %32 = vector.broadcast %30 : vector<1x512xf32> to vector<16x512xf32>
    %33 = arith.mulf %31, %32 : vector<16x512xf32>
    %34 = arith.addf %26, %33 : vector<16x512xf32>
    %c0_15 = arith.constant 0 : index
    %c4 = arith.constant 4 : index
    %35 = vector.load %arg3[%c0_15, %c4] : memref<16x9xf32, #tpu.memory_space<vmem>>, vector<16x1xf32>
    %c4_16 = arith.constant 4 : index
    %c0_17 = arith.constant 0 : index
    %36 = vector.load %arg2[%c4_16, %c0_17] : memref<9x512xf32, #tpu.memory_space<vmem>>, vector<1x512xf32>
    %37 = arith.mulf %1, %36 : vector<1x512xf32>
    %38 = vector.broadcast %35 : vector<16x1xf32> to vector<16x512xf32>
    %39 = vector.broadcast %37 : vector<1x512xf32> to vector<16x512xf32>
    %40 = arith.mulf %38, %39 : vector<16x512xf32>
    %41 = arith.addf %34, %40 : vector<16x512xf32>
    %c0_18 = arith.constant 0 : index
    %c5 = arith.constant 5 : index
    %42 = vector.load %arg3[%c0_18, %c5] : memref<16x9xf32, #tpu.memory_space<vmem>>, vector<16x1xf32>
    %c511_i32 = arith.constant 511 : i32
    %43 = tpu.dynamic_rotate %1 by %c511_i32 dim 1 : vector<1x512xf32>, i32 -> vector<1x512xf32>
    %c5_19 = arith.constant 5 : index
    %c0_20 = arith.constant 0 : index
    %44 = vector.load %arg2[%c5_19, %c0_20] : memref<9x512xf32, #tpu.memory_space<vmem>>, vector<1x512xf32>
    %45 = arith.mulf %43, %44 : vector<1x512xf32>
    %46 = vector.broadcast %42 : vector<16x1xf32> to vector<16x512xf32>
    %47 = vector.broadcast %45 : vector<1x512xf32> to vector<16x512xf32>
    %48 = arith.mulf %46, %47 : vector<16x512xf32>
    %49 = arith.addf %41, %48 : vector<16x512xf32>
    %c0_21 = arith.constant 0 : index
    %c6 = arith.constant 6 : index
    %50 = vector.load %arg3[%c0_21, %c6] : memref<16x9xf32, #tpu.memory_space<vmem>>, vector<16x1xf32>
    %c497_i32 = arith.constant 497 : i32
    %51 = tpu.dynamic_rotate %1 by %c497_i32 dim 1 : vector<1x512xf32>, i32 -> vector<1x512xf32>
    %c6_22 = arith.constant 6 : index
    %c0_23 = arith.constant 0 : index
    %52 = vector.load %arg2[%c6_22, %c0_23] : memref<9x512xf32, #tpu.memory_space<vmem>>, vector<1x512xf32>
    %53 = arith.mulf %51, %52 : vector<1x512xf32>
    %54 = vector.broadcast %50 : vector<16x1xf32> to vector<16x512xf32>
    %55 = vector.broadcast %53 : vector<1x512xf32> to vector<16x512xf32>
    %56 = arith.mulf %54, %55 : vector<16x512xf32>
    %57 = arith.addf %49, %56 : vector<16x512xf32>
    %c0_24 = arith.constant 0 : index
    %c7 = arith.constant 7 : index
    %58 = vector.load %arg3[%c0_24, %c7] : memref<16x9xf32, #tpu.memory_space<vmem>>, vector<16x1xf32>
    %c496_i32 = arith.constant 496 : i32
    %59 = tpu.dynamic_rotate %1 by %c496_i32 dim 1 : vector<1x512xf32>, i32 -> vector<1x512xf32>
    %c7_25 = arith.constant 7 : index
    %c0_26 = arith.constant 0 : index
    %60 = vector.load %arg2[%c7_25, %c0_26] : memref<9x512xf32, #tpu.memory_space<vmem>>, vector<1x512xf32>
    %61 = arith.mulf %59, %60 : vector<1x512xf32>
    %62 = vector.broadcast %58 : vector<16x1xf32> to vector<16x512xf32>
    %63 = vector.broadcast %61 : vector<1x512xf32> to vector<16x512xf32>
    %64 = arith.mulf %62, %63 : vector<16x512xf32>
    %65 = arith.addf %57, %64 : vector<16x512xf32>
    %c0_27 = arith.constant 0 : index
    %c8 = arith.constant 8 : index
    %66 = vector.load %arg3[%c0_27, %c8] : memref<16x9xf32, #tpu.memory_space<vmem>>, vector<16x1xf32>
    %c495_i32 = arith.constant 495 : i32
    %67 = tpu.dynamic_rotate %1 by %c495_i32 dim 1 : vector<1x512xf32>, i32 -> vector<1x512xf32>
    %c8_28 = arith.constant 8 : index
    %c0_29 = arith.constant 0 : index
    %68 = vector.load %arg2[%c8_28, %c0_29] : memref<9x512xf32, #tpu.memory_space<vmem>>, vector<1x512xf32>
    %69 = arith.mulf %67, %68 : vector<1x512xf32>
    %70 = vector.broadcast %66 : vector<16x1xf32> to vector<16x512xf32>
    %71 = vector.broadcast %69 : vector<1x512xf32> to vector<16x512xf32>
    %72 = arith.mulf %70, %71 : vector<16x512xf32>
    %73 = arith.addf %65, %72 : vector<16x512xf32>
    %c0_30 = arith.constant 0 : index
    %c0_31 = arith.constant 0 : index
    %74 = vector.load %arg4[%c0_30, %c0_31] : memref<16x1xf32, #tpu.memory_space<vmem>>, vector<16x1xf32>
    %75 = vector.broadcast %74 : vector<16x1xf32> to vector<16x512xf32>
    %76 = arith.addf %73, %75 : vector<16x512xf32>
    %cst_32 = arith.constant 0.000000e+00 : f32
    %77 = vector.broadcast %cst_32 : f32 to vector<16x512xf32>
    %78 = arith.maximumf %76, %77 : vector<16x512xf32>
    %c17_i32_33 = arith.constant 17 : i32
    %79 = tpu.dynamic_rotate %78 by %c17_i32_33 dim 1 : vector<16x512xf32>, i32 -> vector<16x512xf32>
    %c0_34 = arith.constant 0 : index
    %c0_35 = arith.constant 0 : index
    %80 = vector.load %arg2[%c0_34, %c0_35] : memref<9x512xf32, #tpu.memory_space<vmem>>, vector<1x512xf32>
    %81 = vector.broadcast %80 : vector<1x512xf32> to vector<16x512xf32>
    %82 = arith.mulf %79, %81 : vector<16x512xf32>
    %c0_36 = arith.constant 0 : index
    %c0_37 = arith.constant 0 : index
    %83 = vector.load %arg12[%c0_36, %c0_37] : memref<144x512xf32, #tpu.memory_space<vmem>>, vector<16x512xf32>
    tpu.vector_store %arg12[%c0_36, %c0_37], %82 {strides = array<i32>} : memref<144x512xf32, #tpu.memory_space<vmem>>, vector<16x512xf32>,
    %c16_i32_38 = arith.constant 16 : i32
    %84 = tpu.dynamic_rotate %78 by %c16_i32_38 dim 1 : vector<16x512xf32>, i32 -> vector<16x512xf32>
    %c1_39 = arith.constant 1 : index
    %c0_40 = arith.constant 0 : index
    %85 = vector.load %arg2[%c1_39, %c0_40] : memref<9x512xf32, #tpu.memory_space<vmem>>, vector<1x512xf32>
    %86 = vector.broadcast %85 : vector<1x512xf32> to vector<16x512xf32>
    %87 = arith.mulf %84, %86 : vector<16x512xf32>
    %c16 = arith.constant 16 : index
    %c0_41 = arith.constant 0 : index
    %88 = vector.load %arg12[%c16, %c0_41] : memref<144x512xf32, #tpu.memory_space<vmem>>, vector<16x512xf32>
    tpu.vector_store %arg12[%c16, %c0_41], %87 {strides = array<i32>} : memref<144x512xf32, #tpu.memory_space<vmem>>, vector<16x512xf32>,
    %c15_i32_42 = arith.constant 15 : i32
    %89 = tpu.dynamic_rotate %78 by %c15_i32_42 dim 1 : vector<16x512xf32>, i32 -> vector<16x512xf32>
    %c2_43 = arith.constant 2 : index
    %c0_44 = arith.constant 0 : index
    %90 = vector.load %arg2[%c2_43, %c0_44] : memref<9x512xf32, #tpu.memory_space<vmem>>, vector<1x512xf32>
    %91 = vector.broadcast %90 : vector<1x512xf32> to vector<16x512xf32>
    %92 = arith.mulf %89, %91 : vector<16x512xf32>
    %c32 = arith.constant 32 : index
    %c0_45 = arith.constant 0 : index
    %93 = vector.load %arg12[%c32, %c0_45] : memref<144x512xf32, #tpu.memory_space<vmem>>, vector<16x512xf32>
    tpu.vector_store %arg12[%c32, %c0_45], %92 {strides = array<i32>} : memref<144x512xf32, #tpu.memory_space<vmem>>, vector<16x512xf32>,
    %c1_i32_46 = arith.constant 1 : i32
    %94 = tpu.dynamic_rotate %78 by %c1_i32_46 dim 1 : vector<16x512xf32>, i32 -> vector<16x512xf32>
    %c3_47 = arith.constant 3 : index
    %c0_48 = arith.constant 0 : index
    %95 = vector.load %arg2[%c3_47, %c0_48] : memref<9x512xf32, #tpu.memory_space<vmem>>, vector<1x512xf32>
    %96 = vector.broadcast %95 : vector<1x512xf32> to vector<16x512xf32>
    %97 = arith.mulf %94, %96 : vector<16x512xf32>
    %c48 = arith.constant 48 : index
    %c0_49 = arith.constant 0 : index
    %98 = vector.load %arg12[%c48, %c0_49] : memref<144x512xf32, #tpu.memory_space<vmem>>, vector<16x512xf32>
    tpu.vector_store %arg12[%c48, %c0_49], %97 {strides = array<i32>} : memref<144x512xf32, #tpu.memory_space<vmem>>, vector<16x512xf32>,
    %c4_50 = arith.constant 4 : index
    %c0_51 = arith.constant 0 : index
    %99 = vector.load %arg2[%c4_50, %c0_51] : memref<9x512xf32, #tpu.memory_space<vmem>>, vector<1x512xf32>
    %100 = vector.broadcast %99 : vector<1x512xf32> to vector<16x512xf32>
    %101 = arith.mulf %78, %100 : vector<16x512xf32>
    %c64 = arith.constant 64 : index
    %c0_52 = arith.constant 0 : index
    %102 = vector.load %arg12[%c64, %c0_52] : memref<144x512xf32, #tpu.memory_space<vmem>>, vector<16x512xf32>
    tpu.vector_store %arg12[%c64, %c0_52], %101 {strides = array<i32>} : memref<144x512xf32, #tpu.memory_space<vmem>>, vector<16x512xf32>,
    %c511_i32_53 = arith.constant 511 : i32
    %103 = tpu.dynamic_rotate %78 by %c511_i32_53 dim 1 : vector<16x512xf32>, i32 -> vector<16x512xf32>
    %c5_54 = arith.constant 5 : index
    %c0_55 = arith.constant 0 : index
    %104 = vector.load %arg2[%c5_54, %c0_55] : memref<9x512xf32, #tpu.memory_space<vmem>>, vector<1x512xf32>
    %105 = vector.broadcast %104 : vector<1x512xf32> to vector<16x512xf32>
    %106 = arith.mulf %103, %105 : vector<16x512xf32>
    %c80 = arith.constant 80 : index
    %c0_56 = arith.constant 0 : index
    %107 = vector.load %arg12[%c80, %c0_56] : memref<144x512xf32, #tpu.memory_space<vmem>>, vector<16x512xf32>
    tpu.vector_store %arg12[%c80, %c0_56], %106 {strides = array<i32>} : memref<144x512xf32, #tpu.memory_space<vmem>>, vector<16x512xf32>,
    %c497_i32_57 = arith.constant 497 : i32
    %108 = tpu.dynamic_rotate %78 by %c497_i32_57 dim 1 : vector<16x512xf32>, i32 -> vector<16x512xf32>
    %c6_58 = arith.constant 6 : index
    %c0_59 = arith.constant 0 : index
    %109 = vector.load %arg2[%c6_58, %c0_59] : memref<9x512xf32, #tpu.memory_space<vmem>>, vector<1x512xf32>
    %110 = vector.broadcast %109 : vector<1x512xf32> to vector<16x512xf32>
    %111 = arith.mulf %108, %110 : vector<16x512xf32>
    %c96 = arith.constant 96 : index
    %c0_60 = arith.constant 0 : index
    %112 = vector.load %arg12[%c96, %c0_60] : memref<144x512xf32, #tpu.memory_space<vmem>>, vector<16x512xf32>
    tpu.vector_store %arg12[%c96, %c0_60], %111 {strides = array<i32>} : memref<144x512xf32, #tpu.memory_space<vmem>>, vector<16x512xf32>,
    %c496_i32_61 = arith.constant 496 : i32
    %113 = tpu.dynamic_rotate %78 by %c496_i32_61 dim 1 : vector<16x512xf32>, i32 -> vector<16x512xf32>
    %c7_62 = arith.constant 7 : index
    %c0_63 = arith.constant 0 : index
    %114 = vector.load %arg2[%c7_62, %c0_63] : memref<9x512xf32, #tpu.memory_space<vmem>>, vector<1x512xf32>
    %115 = vector.broadcast %114 : vector<1x512xf32> to vector<16x512xf32>
    %116 = arith.mulf %113, %115 : vector<16x512xf32>
    %c112 = arith.constant 112 : index
    %c0_64 = arith.constant 0 : index
    %117 = vector.load %arg12[%c112, %c0_64] : memref<144x512xf32, #tpu.memory_space<vmem>>, vector<16x512xf32>
    tpu.vector_store %arg12[%c112, %c0_64], %116 {strides = array<i32>} : memref<144x512xf32, #tpu.memory_space<vmem>>, vector<16x512xf32>,
    %c495_i32_65 = arith.constant 495 : i32
    %118 = tpu.dynamic_rotate %78 by %c495_i32_65 dim 1 : vector<16x512xf32>, i32 -> vector<16x512xf32>
    %c8_66 = arith.constant 8 : index
    %c0_67 = arith.constant 0 : index
    %119 = vector.load %arg2[%c8_66, %c0_67] : memref<9x512xf32, #tpu.memory_space<vmem>>, vector<1x512xf32>
    %120 = vector.broadcast %119 : vector<1x512xf32> to vector<16x512xf32>
    %121 = arith.mulf %118, %120 : vector<16x512xf32>
    %c128 = arith.constant 128 : index
    %c0_68 = arith.constant 0 : index
    %122 = vector.load %arg12[%c128, %c0_68] : memref<144x512xf32, #tpu.memory_space<vmem>>, vector<16x512xf32>
    tpu.vector_store %arg12[%c128, %c0_68], %121 {strides = array<i32>} : memref<144x512xf32, #tpu.memory_space<vmem>>, vector<16x512xf32>,
    %c0_69 = arith.constant 0 : index
    %c0_70 = arith.constant 0 : index
    %123 = vector.load %arg5[%c0_69, %c0_70] : memref<16x144xf32, #tpu.memory_space<vmem>>, vector<16x144xf32>
    %c0_71 = arith.constant 0 : index
    %c0_72 = arith.constant 0 : index
    %124 = vector.load %arg12[%c0_71, %c0_72] : memref<144x512xf32, #tpu.memory_space<vmem>>, vector<144x512xf32>
    %cst_73 = arith.constant dense<0.000000e+00> : vector<16x512xf32>
    %125 = tpu.matmul %123, %124, %cst_73 {dimension_numbers = #tpu.dot_dimension_numbers<[1], [0], [0], [1], [0, 0, 1, 1], [], []>} : vector<16x144xf32>, vector<144x512xf32>, vector<16x512xf32> -> vector<16x512xf32>
    %c0_74 = arith.constant 0 : index
    %c0_75 = arith.constant 0 : index
    %126 = vector.load %arg6[%c0_74, %c0_75] : memref<16x1xf32, #tpu.memory_space<vmem>>, vector<16x1xf32>
    %127 = vector.broadcast %126 : vector<16x1xf32> to vector<16x512xf32>
    %128 = arith.addf %125, %127 : vector<16x512xf32>
    %cst_76 = arith.constant 0.000000e+00 : f32
    %129 = vector.broadcast %cst_76 : f32 to vector<16x512xf32>
    %130 = arith.maximumf %128, %129 : vector<16x512xf32>
    %c17_i32_77 = arith.constant 17 : i32
    %131 = tpu.dynamic_rotate %130 by %c17_i32_77 dim 1 : vector<16x512xf32>, i32 -> vector<16x512xf32>
    %c0_78 = arith.constant 0 : index
    %c0_79 = arith.constant 0 : index
    %132 = vector.load %arg2[%c0_78, %c0_79] : memref<9x512xf32, #tpu.memory_space<vmem>>, vector<1x512xf32>
    %133 = vector.broadcast %132 : vector<1x512xf32> to vector<16x512xf32>
    %134 = arith.mulf %131, %133 : vector<16x512xf32>
    %c0_80 = arith.constant 0 : index
    %c0_81 = arith.constant 0 : index
    %135 = vector.load %arg12[%c0_80, %c0_81] : memref<144x512xf32, #tpu.memory_space<vmem>>, vector<16x512xf32>
    tpu.vector_store %arg12[%c0_80, %c0_81], %134 {strides = array<i32>} : memref<144x512xf32, #tpu.memory_space<vmem>>, vector<16x512xf32>,
    %c16_i32_82 = arith.constant 16 : i32
    %136 = tpu.dynamic_rotate %130 by %c16_i32_82 dim 1 : vector<16x512xf32>, i32 -> vector<16x512xf32>
    %c1_83 = arith.constant 1 : index
    %c0_84 = arith.constant 0 : index
    %137 = vector.load %arg2[%c1_83, %c0_84] : memref<9x512xf32, #tpu.memory_space<vmem>>, vector<1x512xf32>
    %138 = vector.broadcast %137 : vector<1x512xf32> to vector<16x512xf32>
    %139 = arith.mulf %136, %138 : vector<16x512xf32>
    %c16_85 = arith.constant 16 : index
    %c0_86 = arith.constant 0 : index
    %140 = vector.load %arg12[%c16_85, %c0_86] : memref<144x512xf32, #tpu.memory_space<vmem>>, vector<16x512xf32>
    tpu.vector_store %arg12[%c16_85, %c0_86], %139 {strides = array<i32>} : memref<144x512xf32, #tpu.memory_space<vmem>>, vector<16x512xf32>,
    %c15_i32_87 = arith.constant 15 : i32
    %141 = tpu.dynamic_rotate %130 by %c15_i32_87 dim 1 : vector<16x512xf32>, i32 -> vector<16x512xf32>
    %c2_88 = arith.constant 2 : index
    %c0_89 = arith.constant 0 : index
    %142 = vector.load %arg2[%c2_88, %c0_89] : memref<9x512xf32, #tpu.memory_space<vmem>>, vector<1x512xf32>
    %143 = vector.broadcast %142 : vector<1x512xf32> to vector<16x512xf32>
    %144 = arith.mulf %141, %143 : vector<16x512xf32>
    %c32_90 = arith.constant 32 : index
    %c0_91 = arith.constant 0 : index
    %145 = vector.load %arg12[%c32_90, %c0_91] : memref<144x512xf32, #tpu.memory_space<vmem>>, vector<16x512xf32>
    tpu.vector_store %arg12[%c32_90, %c0_91], %144 {strides = array<i32>} : memref<144x512xf32, #tpu.memory_space<vmem>>, vector<16x512xf32>,
    %c1_i32_92 = arith.constant 1 : i32
    %146 = tpu.dynamic_rotate %130 by %c1_i32_92 dim 1 : vector<16x512xf32>, i32 -> vector<16x512xf32>
    %c3_93 = arith.constant 3 : index
    %c0_94 = arith.constant 0 : index
    %147 = vector.load %arg2[%c3_93, %c0_94] : memref<9x512xf32, #tpu.memory_space<vmem>>, vector<1x512xf32>
    %148 = vector.broadcast %147 : vector<1x512xf32> to vector<16x512xf32>
    %149 = arith.mulf %146, %148 : vector<16x512xf32>
    %c48_95 = arith.constant 48 : index
    %c0_96 = arith.constant 0 : index
    %150 = vector.load %arg12[%c48_95, %c0_96] : memref<144x512xf32, #tpu.memory_space<vmem>>, vector<16x512xf32>
    tpu.vector_store %arg12[%c48_95, %c0_96], %149 {strides = array<i32>} : memref<144x512xf32, #tpu.memory_space<vmem>>, vector<16x512xf32>,
    %c4_97 = arith.constant 4 : index
    %c0_98 = arith.constant 0 : index
    %151 = vector.load %arg2[%c4_97, %c0_98] : memref<9x512xf32, #tpu.memory_space<vmem>>, vector<1x512xf32>
    %152 = vector.broadcast %151 : vector<1x512xf32> to vector<16x512xf32>
    %153 = arith.mulf %130, %152 : vector<16x512xf32>
    %c64_99 = arith.constant 64 : index
    %c0_100 = arith.constant 0 : index
    %154 = vector.load %arg12[%c64_99, %c0_100] : memref<144x512xf32, #tpu.memory_space<vmem>>, vector<16x512xf32>
    tpu.vector_store %arg12[%c64_99, %c0_100], %153 {strides = array<i32>} : memref<144x512xf32, #tpu.memory_space<vmem>>, vector<16x512xf32>,
    %c511_i32_101 = arith.constant 511 : i32
    %155 = tpu.dynamic_rotate %130 by %c511_i32_101 dim 1 : vector<16x512xf32>, i32 -> vector<16x512xf32>
    %c5_102 = arith.constant 5 : index
    %c0_103 = arith.constant 0 : index
    %156 = vector.load %arg2[%c5_102, %c0_103] : memref<9x512xf32, #tpu.memory_space<vmem>>, vector<1x512xf32>
    %157 = vector.broadcast %156 : vector<1x512xf32> to vector<16x512xf32>
    %158 = arith.mulf %155, %157 : vector<16x512xf32>
    %c80_104 = arith.constant 80 : index
    %c0_105 = arith.constant 0 : index
    %159 = vector.load %arg12[%c80_104, %c0_105] : memref<144x512xf32, #tpu.memory_space<vmem>>, vector<16x512xf32>
    tpu.vector_store %arg12[%c80_104, %c0_105], %158 {strides = array<i32>} : memref<144x512xf32, #tpu.memory_space<vmem>>, vector<16x512xf32>,
    %c497_i32_106 = arith.constant 497 : i32
    %160 = tpu.dynamic_rotate %130 by %c497_i32_106 dim 1 : vector<16x512xf32>, i32 -> vector<16x512xf32>
    %c6_107 = arith.constant 6 : index
    %c0_108 = arith.constant 0 : index
    %161 = vector.load %arg2[%c6_107, %c0_108] : memref<9x512xf32, #tpu.memory_space<vmem>>, vector<1x512xf32>
    %162 = vector.broadcast %161 : vector<1x512xf32> to vector<16x512xf32>
    %163 = arith.mulf %160, %162 : vector<16x512xf32>
    %c96_109 = arith.constant 96 : index
    %c0_110 = arith.constant 0 : index
    %164 = vector.load %arg12[%c96_109, %c0_110] : memref<144x512xf32, #tpu.memory_space<vmem>>, vector<16x512xf32>
    tpu.vector_store %arg12[%c96_109, %c0_110], %163 {strides = array<i32>} : memref<144x512xf32, #tpu.memory_space<vmem>>, vector<16x512xf32>,
    %c496_i32_111 = arith.constant 496 : i32
    %165 = tpu.dynamic_rotate %130 by %c496_i32_111 dim 1 : vector<16x512xf32>, i32 -> vector<16x512xf32>
    %c7_112 = arith.constant 7 : index
    %c0_113 = arith.constant 0 : index
    %166 = vector.load %arg2[%c7_112, %c0_113] : memref<9x512xf32, #tpu.memory_space<vmem>>, vector<1x512xf32>
    %167 = vector.broadcast %166 : vector<1x512xf32> to vector<16x512xf32>
    %168 = arith.mulf %165, %167 : vector<16x512xf32>
    %c112_114 = arith.constant 112 : index
    %c0_115 = arith.constant 0 : index
    %169 = vector.load %arg12[%c112_114, %c0_115] : memref<144x512xf32, #tpu.memory_space<vmem>>, vector<16x512xf32>
    tpu.vector_store %arg12[%c112_114, %c0_115], %168 {strides = array<i32>} : memref<144x512xf32, #tpu.memory_space<vmem>>, vector<16x512xf32>,
    %c495_i32_116 = arith.constant 495 : i32
    %170 = tpu.dynamic_rotate %130 by %c495_i32_116 dim 1 : vector<16x512xf32>, i32 -> vector<16x512xf32>
    %c8_117 = arith.constant 8 : index
    %c0_118 = arith.constant 0 : index
    %171 = vector.load %arg2[%c8_117, %c0_118] : memref<9x512xf32, #tpu.memory_space<vmem>>, vector<1x512xf32>
    %172 = vector.broadcast %171 : vector<1x512xf32> to vector<16x512xf32>
    %173 = arith.mulf %170, %172 : vector<16x512xf32>
    %c128_119 = arith.constant 128 : index
    %c0_120 = arith.constant 0 : index
    %174 = vector.load %arg12[%c128_119, %c0_120] : memref<144x512xf32, #tpu.memory_space<vmem>>, vector<16x512xf32>
    tpu.vector_store %arg12[%c128_119, %c0_120], %173 {strides = array<i32>} : memref<144x512xf32, #tpu.memory_space<vmem>>, vector<16x512xf32>,
    %c0_121 = arith.constant 0 : index
    %c0_122 = arith.constant 0 : index
    %175 = vector.load %arg7[%c0_121, %c0_122] : memref<16x144xf32, #tpu.memory_space<vmem>>, vector<16x144xf32>
    %c0_123 = arith.constant 0 : index
    %c0_124 = arith.constant 0 : index
    %176 = vector.load %arg12[%c0_123, %c0_124] : memref<144x512xf32, #tpu.memory_space<vmem>>, vector<144x512xf32>
    %cst_125 = arith.constant dense<0.000000e+00> : vector<16x512xf32>
    %177 = tpu.matmul %175, %176, %cst_125 {dimension_numbers = #tpu.dot_dimension_numbers<[1], [0], [0], [1], [0, 0, 1, 1], [], []>} : vector<16x144xf32>, vector<144x512xf32>, vector<16x512xf32> -> vector<16x512xf32>
    %c0_126 = arith.constant 0 : index
    %c0_127 = arith.constant 0 : index
    %178 = vector.load %arg8[%c0_126, %c0_127] : memref<16x1xf32, #tpu.memory_space<vmem>>, vector<16x1xf32>
    %179 = vector.broadcast %178 : vector<16x1xf32> to vector<16x512xf32>
    %180 = arith.addf %177, %179 : vector<16x512xf32>
    %cst_128 = arith.constant 0.000000e+00 : f32
    %181 = vector.broadcast %cst_128 : f32 to vector<16x512xf32>
    %182 = arith.maximumf %180, %181 : vector<16x512xf32>
    %c0_129 = arith.constant 0 : index
    %c0_130 = arith.constant 0 : index
    %183 = vector.load %arg9[%c0_129, %c0_130] : memref<10x16xf32, #tpu.memory_space<vmem>>, vector<10x16xf32>
    %cst_131 = arith.constant dense<0.000000e+00> : vector<10x512xf32>
    %184 = tpu.matmul %183, %182, %cst_131 {dimension_numbers = #tpu.dot_dimension_numbers<[1], [0], [0], [1], [0, 0, 1, 1], [], []>} : vector<10x16xf32>, vector<16x512xf32>, vector<10x512xf32> -> vector<10x512xf32>
    %185 = vector.extract_strided_slice %184 {offsets = [0, 0], sizes = [10, 256], strides = [1, 1]} : vector<10x512xf32> to vector<10x256xf32>
    %cst_132 = arith.constant dense<0.000000e+00> : vector<10xf32>
    %186 = vector.multi_reduction <add>, %185, %cst_132 [1] : vector<10x256xf32> to vector<10xf32>
    %187 = vector.shape_cast %186 : vector<10xf32> to vector<10x1xf32>
    %cst_133 = arith.constant 3.906250e-03 : f32
    %188 = vector.broadcast %cst_133 : f32 to vector<10x1xf32>
    %189 = arith.mulf %187, %188 : vector<10x1xf32>
    %c0_134 = arith.constant 0 : index
    %c0_135 = arith.constant 0 : index
    %190 = vector.load %arg10[%c0_134, %c0_135] : memref<10x1xf32, #tpu.memory_space<vmem>>, vector<10x1xf32>
    %191 = arith.addf %189, %190 : vector<10x1xf32>
    %192 = vector.extract_strided_slice %184 {offsets = [0, 256], sizes = [10, 256], strides = [1, 1]} : vector<10x512xf32> to vector<10x256xf32>
    %cst_136 = arith.constant dense<0.000000e+00> : vector<10xf32>
    %193 = vector.multi_reduction <add>, %192, %cst_136 [1] : vector<10x256xf32> to vector<10xf32>
    %194 = vector.shape_cast %193 : vector<10xf32> to vector<10x1xf32>
    %cst_137 = arith.constant 3.906250e-03 : f32
    %195 = vector.broadcast %cst_137 : f32 to vector<10x1xf32>
    %196 = arith.mulf %194, %195 : vector<10x1xf32>
    %c0_138 = arith.constant 0 : index
    %c0_139 = arith.constant 0 : index
    %197 = vector.load %arg10[%c0_138, %c0_139] : memref<10x1xf32, #tpu.memory_space<vmem>>, vector<10x1xf32>
    %198 = arith.addf %196, %197 : vector<10x1xf32>
    %199 = tpu.concatenate %191, %198 in 1 : vector<10x1xf32>, vector<10x1xf32> -> vector<10x2xf32>
    %c0_140 = arith.constant 0 : index
    %c0_141 = arith.constant 0 : index
    %c0_142 = arith.constant 0 : index
    %200 = vector.load %arg11[%c0_140, %c0_141, %c0_142] : memref<1x10x2xf32, #tpu.memory_space<vmem>>, vector<1x10x2xf32>
    %201 = vector.shape_cast %200 : vector<1x10x2xf32> to vector<10x2xf32>
    %202 = vector.shape_cast %199 : vector<10x2xf32> to vector<1x10x2xf32>
    tpu.vector_store %arg11[%c0_140, %c0_141, %c0_142], %202 {strides = array<i32>} : memref<1x10x2xf32, #tpu.memory_space<vmem>>, vector<1x10x2xf32>,
    return
  }
  func.func @transform_0(%arg0: i32) -> (i32, i32, i32) {
    %c0_i32 = arith.constant 0 : i32
    %c0_i32_0 = arith.constant 0 : i32
    %c0_i32_1 = arith.constant 0 : i32
    return %arg0, %c0_i32, %c0_i32_0 : i32, i32, i32
  }
  func.func @transform_1(%arg0: i32) -> (i32, i32) {
    %c0_i32 = arith.constant 0 : i32
    %c0_i32_0 = arith.constant 0 : i32
    %c0_i32_1 = arith.constant 0 : i32
    return %c0_i32, %c0_i32_0 : i32, i32
  }
  func.func @transform_2(%arg0: i32) -> (i32, i32) {
    %c0_i32 = arith.constant 0 : i32
    %c0_i32_0 = arith.constant 0 : i32
    %c0_i32_1 = arith.constant 0 : i32
    return %c0_i32, %c0_i32_0 : i32, i32
  }
  func.func @transform_3(%arg0: i32) -> (i32, i32) {
    %c0_i32 = arith.constant 0 : i32
    %c0_i32_0 = arith.constant 0 : i32
    %c0_i32_1 = arith.constant 0 : i32
    return %c0_i32, %c0_i32_0 : i32, i32
  }
  func.func @transform_4(%arg0: i32) -> (i32, i32) {
    %c0_i32 = arith.constant 0 : i32
    %c0_i32_0 = arith.constant 0 : i32
    %c0_i32_1 = arith.constant 0 : i32
    return %c0_i32, %c0_i32_0 : i32, i32
  }
  func.func @transform_5(%arg0: i32) -> (i32, i32) {
    %c0_i32 = arith.constant 0 : i32
    %c0_i32_0 = arith.constant 0 : i32
    %c0_i32_1 = arith.constant 0 : i32
    return %c0_i32, %c0_i32_0 : i32, i32
  }
  func.func @transform_6(%arg0: i32) -> (i32, i32) {
    %c0_i32 = arith.constant 0 : i32
    %c0_i32_0 = arith.constant 0 : i32
    %c0_i32_1 = arith.constant 0 : i32
    return %c0_i32, %c0_i32_0 : i32, i32
  }
  func.func @transform_7(%arg0: i32) -> (i32, i32) {
    %c0_i32 = arith.constant 0 : i32
    %c0_i32_0 = arith.constant 0 : i32
    %c0_i32_1 = arith.constant 0 : i32
    return %c0_i32, %c0_i32_0 : i32, i32
  }
  func.func @transform_8(%arg0: i32) -> (i32, i32) {
    %c0_i32 = arith.constant 0 : i32
    %c0_i32_0 = arith.constant 0 : i32
    %c0_i32_1 = arith.constant 0 : i32
    return %c0_i32, %c0_i32_0 : i32, i32
  }
  func.func @transform_9(%arg0: i32) -> (i32, i32) {
    %c0_i32 = arith.constant 0 : i32
    %c0_i32_0 = arith.constant 0 : i32
    %c0_i32_1 = arith.constant 0 : i32
    return %c0_i32, %c0_i32_0 : i32, i32
  }
  func.func @transform_10(%arg0: i32) -> (i32, i32, i32) {
    %c0_i32 = arith.constant 0 : i32
    %c0_i32_0 = arith.constant 0 : i32
    %c0_i32_1 = arith.constant 0 : i32
    return %arg0, %c0_i32, %c0_i32_0 : i32, i32, i32
  }
}

</mosaic_0001>

<bundles_post_ra>
// kernel: small_cnn_forward.1
= control target key start
LH: loop header
LB: loop body
LE: loop exit
PB: predicated region body
PF: predicated region fallthrough
CT: control target
= control target key end

     0   :  { %v2210_v1 = vmov 1   ;;  %s2211_s15 = smov 17   ;;  %s2212_s16 = smov 16   ;;  %v2213_v5 = vmov 0   ;;  %v2217_v9 = vmov 2   ;;  %v2218_v10 = vmov 4   ;;  %s4203_s0 = inlined_call_operand.vmem [shape: f32[1,1,512], index: 0, kind: input, shape index: {}]   ;;  %s4204_s2 = inlined_call_operand.vmem [shape: f32[16,9], index: 2, kind: input, shape index: {}]   ;;  %s4205_s3 = inlined_call_operand.vmem [shape: f32[16,1], index: 3, kind: input, shape index: {}]   ;;  %s4206_s1 = inlined_call_operand.vmem [shape: f32[9,512], index: 1, kind: input, shape index: {}]   ;;  %s4207_s5 = inlined_call_operand.vmem [shape: f32[16,1], index: 5, kind: input, shape index: {}]   ;;  %s4208_s4 = inlined_call_operand.vmem [shape: f32[16,144], index: 4, kind: input, shape index: {}]   ;;  %s4209_s7 = inlined_call_operand.vmem [shape: f32[16,1], index: 7, kind: input, shape index: {}]   ;;  %s4210_s6 = inlined_call_operand.vmem [shape: f32[16,144], index: 6, kind: input, shape index: {}]   ;;  %s4211_s8 = inlined_call_operand.vmem [shape: f32[10,16], index: 8, kind: input, shape index: {}]   ;;  %s4212_s9 = inlined_call_operand.vmem [shape: f32[10,1], index: 9, kind: input, shape index: {}]   ;;  %s4213_s10 = inlined_call_operand.vmem [shape: f32[1,10,2], index: 10, kind: output, shape index: {}]  }
   0x1   :  { %v2285_v0 = vld [vmem:[%s4203_s0] sm:$0xf]  ;;  %2194 = vset.pattern.permute.xlu0 %v2210_v1  ;;  %2192 = vset.pattern.permute.xlu1 %v2210_v1  ;;  %s2214_s0 = smov 15   ;;  %s2215_s17 = smov 1   ;;  %v2325_v7 = vld [vmem:[%s4204_s2 + $0x8] sm:$0xff]  ;;  %v2219_v11 = vmov 3   ;;  %v55_v38 = vlaneseq }
   0x2   :  { %v2288_v2 = vperm.slane %v2285_v0, 2  ;;  %v2291_v3 = vperm.slane %v2285_v0, 1  ;;  %v2294_v4 = vperm.slane %v2285_v0, 0  ;;  %2193 = vset.pattern.permute.xlu2 %v2213_v5  ;;  %v42_v6 = vperm.slane %v2285_v0, 3  ;;  %v2330_v8 = vld [vmem:[%s4204_s2] sm:$0xff]  ;;  %s2216_s22 = smov 127  }
   0x3   :  { %s2220_s2 = smov 113   ;;  %s2221_s23 = smov 112   ;;  %v2222_v12 = vmov 5   ;;  %v2223_v13 = vmov 6   ;;  %v534_v20 = vld [vmem:[%s4205_s3] sm:$0xff]  ;;  %v2225_v21 = vmov 7  }
   0x4   :  { %51 = vrot.lane.b32.xlu1 %v2288_v2, %s2211_s15  ;;  %108 = vrot.lane.b32.xlu2 %v2291_v3, %s2212_s16  ;;  %s2224_s24 = smov 111   ;;  %v2226_v25 = vmov 8   ;;  %v535_v29 = vld [vmem:[%s4205_s3 + $0x8] sm:$0xff]  ;;  %v2433_v40 = vand.u32 127, %v55_v38  ;;  %vm1066_vm8 = vcmask 130048   ;;  %vm2080_vm9 = vcmask 1041408  }
   0x5   :  { %47 = vrot.lane.b32.xlu0 %v2294_v4, %s2211_s15  ;;  %v2438_v41 = vld [vmem:[%s4206_s1 + $0x1] ss:$8 sm:$0xf]  ;;  %v2451_v46 = vld [vmem:[%s4206_s1] ss:$8 sm:$0xf] }
   0x6   :  { %vm114_vm0 = vcmp.lt.s32.totalorder %v2433_v40, 16  ;;  %v125_v44 = vperm.slane %v2438_v41, 3  ;;  %vm57_vm1 = vcmp.lt.s32.totalorder %v2433_v40, 17  ;;  %v2459_v48 = vperm.slane %v2451_v46, 3 }
   0x7   :  { %v2470_v51 = vld [vmem:[%s4206_s1 + $0x2] ss:$8 sm:$0xf]  ;;  %vm170_vm2 = vcmp.lt.s32.totalorder %v2433_v40, 15  ;;  %vm226_vm3 = vcmp.lt.s32.totalorder %v2433_v40, 1  ;;  %vm318_vm4 = vcmp.lt.s32.totalorder %v2433_v40, 127 }
   0x8   :  { %4253 = vst [vmem:[#allocation8_spill] sm:$0xff] %v2459_v48  ;;  %v181_v52 = vperm.slane %v2470_v51, 3  ;;  %vm374_vm5 = vcmp.lt.s32.totalorder %v2433_v40, 113  ;;  %vm430_vm6 = vcmp.lt.s32.totalorder %v2433_v40, 112  ;;  %vm486_vm7 = vcmp.lt.s32.totalorder %v2433_v40, 111 }
   0x9   :  { %vm2112_vm10 = vcmask 7168   ;;  %vm2115_vm11 = vcmask 15360   ;;  %vm2117_vm12 = vcmask 9216  }
   0xc   :  { %110 = vrot.lane.b32.xlu2 %v2288_v2, %s2212_s16  ;;  %106 = vrot.lane.b32.xlu1 %v2294_v4, %s2212_s16 }
   0xd   :  { %49 = vrot.lane.b32.xlu0 %v2291_v3, %s2211_s15 }
  0x14   :  { %166 = vrot.lane.b32.xlu2 %v2288_v2, %s2214_s0  ;;  %164 = vrot.lane.b32.xlu1 %v2291_v3, %s2214_s0 }
  0x15   :  { %162 = vrot.lane.b32.xlu0 %v2294_v4, %s2214_s0 }
  0x1c   :  { %222 = vrot.lane.b32.xlu2 %v2288_v2, %s2215_s17  ;;  %220 = vrot.lane.b32.xlu1 %v2291_v3, %s2215_s17 }
  0x1d   :  { %218 = vrot.lane.b32.xlu0 %v2294_v4, %s2215_s17 }
  0x24   :  { %53 = vrot.lane.b32.xlu2 %v42_v6, %s2211_s15  ;;  %139 = vperm.xlu1 %2192, %v2325_v7  }
  0x25   :  { %135 = vperm.xlu0 %2194, %v2330_v8  }
  0x2c   :  { %78 = vperm.xlu2 %2193, %v2330_v8   ;;  %112 = vrot.lane.b32.xlu1 %v42_v6, %s2212_s16 }
  0x2d   :  { %316 = vrot.lane.b32.xlu0 %v42_v6, %s2216_s22  ;;  %2195 = vset.pattern.permute.xlu1 %v2217_v9 }
  0x2e   :  { %2199 = vset.pattern.permute.xlu0 %v2218_v10 }
  0x34   :  { %168 = vrot.lane.b32.xlu2 %v42_v6, %s2214_s0  ;;  %195 = vperm.xlu1 %2195, %v2325_v7  }
  0x35   :  { %224 = vrot.lane.b32.xlu0 %v42_v6, %s2215_s17  ;;  %2196 = vset.pattern.permute.xlu2 %v2219_v11 }
  0x3c   :  { %314 = vrot.lane.b32.xlu2 %v2288_v2, %s2216_s22  ;;  %312 = vrot.lane.b32.xlu1 %v2291_v3, %s2216_s22 }
  0x3d   :  { %372 = vrot.lane.b32.xlu0 %v42_v6, %s2220_s2 }
  0x44   :  { %251 = vperm.xlu2 %2196, %v2325_v7   ;;  %191 = vperm.xlu1 %2195, %v2330_v8  }
  0x45   :  { %424 = vrot.lane.b32.xlu0 %v2291_v3, %s2221_s23 }
  0x4c   :  { %370 = vrot.lane.b32.xlu2 %v2288_v2, %s2220_s2  ;;  %368 = vrot.lane.b32.xlu1 %v2291_v3, %s2220_s2 }
  0x4d   :  { %278 = vperm.xlu0 %2199, %v2330_v8   ;;  %2198 = vset.pattern.permute.xlu2 %v2218_v10  ;;  %v2126_v10 = vld [vmem:[%s4206_s1 + $0x4] ss:$8 sm:$0xf] }
  0x4e   :  { %2197 = vset.pattern.permute.xlu1 %v2219_v11 }
  0x54   :  { %282 = vperm.xlu2 %2198, %v2325_v7   ;;  %247 = vperm.xlu1 %2197, %v2330_v8  }
  0x55   :  { %2200 = vset.pattern.permute.xlu0 %v2213_v5 }
  0x56   :  { %83 = vperm.xlu0 %2200, %v2325_v7  }
  0x5c   :  { %428 = vrot.lane.b32.xlu2 %v42_v6, %s2221_s23  ;;  %426 = vrot.lane.b32.xlu1 %v2288_v2, %s2221_s23 }
  0x5d   :  { %2201 = vset.pattern.permute.xlu1 %v2222_v12  ;;  %2202 = vset.pattern.permute.xlu2 %v2223_v13 }
  0x5e   :  { %484 = vrot.lane.b32.xlu0 %v42_v6, %s2224_s24  ;;  %v2363_v14 = vpop.permute.xlu2 %108 }
  0x64   :  { %310 = vrot.lane.b32.xlu2 %v2294_v4, %s2216_s22  ;;  %343 = vperm.xlu1 %2201, %v2325_v7  }
  0x66   :  { %366 = vrot.lane.b32.xlu0 %v2294_v4, %s2220_s2  ;;  %v2370_v15 = vpop.permute.xlu2 %110 }
  0x67   :  { %v116_v38 = vsel %vm114_vm0, %v2363_v14, %v2370_v15 }
  0x6c   :  { %482 = vrot.lane.b32.xlu2 %v2288_v2, %s2224_s24  ;;  %480 = vrot.lane.b32.xlu1 %v2291_v3, %s2224_s24 }
  0x6e   :  { %422 = vrot.lane.b32.xlu0 %v2294_v4, %s2221_s23  ;;  %v2378_v16 = vpop.permute.xlu2 %166 }
  0x74   :  { %399 = vperm.xlu2 %2202, %v2325_v7   ;;  %339 = vperm.xlu1 %2201, %v2330_v8  }
  0x76   :  { %478 = vrot.lane.b32.xlu0 %v2294_v4, %s2224_s24  ;;  %v2384_v17 = vpop.permute.xlu1 %51  ;;  %v2386_v18 = vpop.permute.xlu2 %222 }
  0x77   :  { %v2388_v19 = vpop.permute.xlu0 %47 }
  0x7c   :  { %2204 = vset.pattern.permute.xlu2 %v2225_v21  ;;  %2203 = vset.pattern.permute.xlu1 %v2223_v13 }
  0x7d   :  { %455 = vperm.xlu2 %2204, %v2325_v7   ;;  %395 = vperm.xlu1 %2203, %v2330_v8  }
  0x7e   :  { %538 = vperm.xlu0 %2200, %v534_v20   ;;  %v2395_v22 = vpop.permute.xlu2 %53  ;;  %v2397_v23 = vpop.permute.xlu1 %106  ;;  %v124_v20 = vperm.slane %v2438_v41, 2 }
  0x7f   :  { %v2399_v24 = vpop.permute.xlu0 %49  ;;  %v58_v50 = vsel %vm57_vm1, %v2384_v17, %v2395_v22 }
  0x80   :  { %v2483_v56 = vmul.f32 %v2459_v48, %v58_v50  ;;  %v59_v50 = vsel %vm57_vm1, %v2399_v24, %v2384_v17 }
  0x82   :  { %v89_v60 = vperm.slane %v2483_v56, 0 }
  0x85   :  { %2206 = vset.pattern.permute.xlu2 %v2226_v25  ;;  %2205 = vset.pattern.permute.xlu1 %v2225_v21  ;;  %v123_v21 = vperm.slane %v2438_v41, 1 }
  0x86   :  { %v2401_v26 = vpop.permute.xlu2 %78  ;;  %511 = vperm.xlu2 %2206, %v2325_v7   ;;  %451 = vperm.xlu1 %2205, %v2330_v8   ;;  %v2405_v27 = vpop.permute.xlu1 %164  ;;  %v2504_v7 = vld [vmem:[%s4206_s1 + $0x3] ss:$8 sm:$0xf] }
  0x87   :  { %v2407_v28 = vpop.permute.xlu0 %162  ;;  %v93_v62 = vmul.f32 %v89_v60, %v2401_v26 }
  0x88   :  { %v173_v17 = vsel %vm170_vm2, %v2407_v28, %v2405_v27 }
  0x8e   :  { %v2412_v30 = vpop.permute.xlu2 %168  ;;  %2208 = vset.pattern.permute.xlu2 %v2213_v5  ;;  %2207 = vset.pattern.permute.xlu1 %v2226_v25  ;;  %v2415_v31 = vpop.permute.xlu1 %220  ;;  %v2524_v25 = vperm.slane %v2451_v46, 1 }
  0x8f   :  { %v2417_v32 = vpop.permute.xlu0 %218  ;;  %543 = vperm.xlu2 %2208, %v535_v29   ;;  %507 = vperm.xlu1 %2207, %v2330_v8   ;;  %v171_v53 = vsel %vm170_vm2, %v2378_v16, %v2412_v30  ;;  %v237_v8 = vperm.slane %v2504_v7, 3  ;;  %v2527_v29 = vperm.slane %v2451_v46, 2 }
  0x90   :  { %4248 = vst [vmem:[#allocation3_spill] sm:$0xff] %v2417_v32  ;;  %v2488_v59 = vmul.f32 %v181_v52, %v171_v53  ;;  %v60_v52 = vsel %vm57_vm1, %v2388_v19, %v2399_v24  ;;  %v2554_v53 = vmul.f32 %v124_v20, %v116_v38 }
  0x91   :  { %4259 = vst [vmem:[#allocation14_spill] sm:$0xff] %v2524_v25  ;;  %v2563_v24 = vmul.f32 %v2524_v25, %v60_v52 }
  0x92   :  { %v201_v63 = vperm.slane %v2488_v59, 0  ;;  %4260 = vst [vmem:[#allocation15_spill] sm:$0xff] %v2527_v29  ;;  %v2566_v59 = vmul.f32 %v2527_v29, %v59_v50  ;;  %v229_v50 = vsel %vm226_vm3, %v2417_v32, %v2415_v31 }
  0x96   :  { %v2420_v33 = vpop.permute.xlu2 %314  ;;  %v2422_v34 = vpop.permute.xlu1 %139 }
  0x97   :  { %4249 = vst [vmem:[#allocation4_spill] sm:$0xff] %v2422_v34  ;;  %v2424_v35 = vpop.permute.xlu0 %135  ;;  %2209 = vset.pattern.permute.xlu1 %v2213_v5 }
  0x9e   :  { %v2427_v36 = vpop.permute.xlu2 %251  ;;  %v2429_v37 = vpop.permute.xlu1 %112 }
  0x9f   :  { %4250 = vst [vmem:[#allocation5_spill] sm:$0xff] %v2427_v36  ;;  %v2431_v39 = vpop.permute.xlu0 %316  ;;  %v115_v47 = vsel %vm114_vm0, %v2370_v15, %v2429_v37  ;;  %v180_v15 = vperm.slane %v2470_v51, 2 }
  0xa0   :  { %v2461_v49 = vmul.f32 %v125_v44, %v115_v47  ;;  %v117_v44 = vsel %vm114_vm0, %v2397_v23, %v2363_v14  ;;  %v172_v14 = vsel %vm170_vm2, %v2405_v27, %v2378_v16  ;;  %v235_v27 = vperm.slane %v2504_v7, 1 }
  0xa1   :  { %v2556_v56 = vmul.f32 %v123_v21, %v117_v44 }
  0xa2   :  { %v145_v57 = vperm.slane %v2461_v49, 0  ;;  %v2538_v49 = vmul.f32 %v2126_v10, %v2285_v0  ;;  %v179_v0 = vperm.slane %v2470_v51, 1  ;;  %v2582_v10 = vld [vmem:[%s4206_s1 + $0x5] ss:$8 sm:$0xf]  ;;  %v2608_v48 = vmul.f32 %v235_v27, %v229_v50 }
  0xa3   :  { %4261 = vst [vmem:[#allocation16_spill] sm:$0xff] %v2582_v10  ;;  %v327_v27 = vperm.slane %v2582_v10, 1  ;;  %v4266_v50 = vperm.slane %v2554_v53, 0 }
  0xa4   :  { %v149_v61 = vmul.f32 %v145_v57, %v2424_v35  ;;  %v289_v16 = vperm.slane %v2538_v49, 3  ;;  %v153_v38 = vmul.f32 %v145_v57, %v2422_v34  ;;  %v4264_v57 = vperm.slane %v2566_v59, 0 }
  0xa6   :  { %v2440_v42 = vpop.permute.xlu2 %370  ;;  %v2442_v43 = vpop.permute.xlu1 %195  ;;  %v157_v3 = vadd.f32 %v149_v61, %v93_v62  ;;  %v2569_v62 = vmul.f32 %v180_v15, %v172_v14 }
  0xa7   :  { %4251 = vst [vmem:[#allocation6_spill] sm:$0xff] %v2442_v43  ;;  %v2446_v45 = vpop.permute.xlu0 %224  ;;  %v209_v14 = vmul.f32 %v201_v63, %v2442_v43 }
  0xa8   :  { %4252 = vst [vmem:[#allocation7_spill] sm:$0xff] %v2446_v45  ;;  %v227_v9 = vsel %vm226_vm3, %v2386_v18, %v2446_v45 }
  0xa9   :  { %v245_v47 = vmul.f32 %v237_v8, %v227_v9  ;;  %v2576_v9 = vmul.f32 %v179_v0, %v173_v17 }
  0xab   :  { %v257_v61 = vperm.slane %v245_v47, 0  ;;  %v228_v47 = vsel %vm226_vm3, %v2415_v31, %v2386_v18  ;;  %v328_v18 = vperm.slane %v2582_v10, 2 }
  0xae   :  { %v2478_v54 = vpop.permute.xlu2 %282  ;;  %v2480_v55 = vpop.permute.xlu1 %312 }
  0xaf   :  { %4254 = vst [vmem:[#allocation9_spill] sm:$0xff] %v2478_v54  ;;  %v2486_v58 = vpop.permute.xlu0 %372 }
  0xb0   :  { %4255 = vst [vmem:[#allocation10_spill] sm:$0xff] %v2480_v55 }
  0xb6   :  { %v2494_v1 = vpop.permute.xlu2 %428  ;;  %v2496_v2 = vpop.permute.xlu1 %191 }
  0xb7   :  { %v205_v4 = vmul.f32 %v201_v63, %v2496_v2  ;;  %v2499_v5 = vpop.permute.xlu0 %424  ;;  %v329_v63 = vperm.slane %v2582_v10, 3  ;;  %v265_v10 = vmul.f32 %v257_v61, %v2427_v36 }
  0xb8   :  { %4256 = vst [vmem:[#allocation11_spill] sm:$0xff] %v2499_v5 }
  0xb9   :  { %v213_v6 = vadd.f32 %v205_v4, %v157_v3  ;;  %v236_v3 = vperm.slane %v2504_v7, 2 }
  0xbb   :  { %v2606_v31 = vmul.f32 %v236_v3, %v228_v47  ;;  %v301_v3 = vmul.f32 %v289_v16, %v2478_v54 }
  0xbe   :  { %v2515_v11 = vpop.permute.xlu2 %310  ;;  %v2517_v12 = vpop.permute.xlu1 %368 }
  0xbf   :  { %4257 = vst [vmem:[#allocation12_spill] sm:$0xff] %v2515_v11  ;;  %v2519_v13 = vpop.permute.xlu0 %278 }
  0xc0   :  { %4258 = vst [vmem:[#allocation13_spill] sm:$0xff] %v2517_v12  ;;  %v297_v20 = vmul.f32 %v289_v16, %v2519_v13  ;;  %v4271_v16 = vperm.slane %v2608_v48, 0 }
  0xc6   :  { %v2572_v4 = vpop.permute.xlu2 %482  ;;  %v2574_v8 = vpop.permute.xlu1 %247 }
  0xc7   :  { %v261_v21 = vmul.f32 %v257_v61, %v2574_v8  ;;  %v320_v61 = vsel %vm318_vm4, %v2480_v55, %v2420_v33  ;;  %v4275_v55 = vperm.slane %v2538_v49, 2 }
  0xc8   :  { %v2596_v52 = vpop.permute.xlu0 %83 }
  0xc9   :  { %4262 = vst [vmem:[#allocation17_spill] sm:$0xff] %v2596_v52  ;;  %v269_v0 = vadd.f32 %v261_v21, %v213_v6  ;;  %v97_v44 = vmul.f32 %v89_v60, %v2596_v52  ;;  %v4263_v6 = vperm.slane %v2563_v24, 0  ;;  %v96_v17 = vmul.f32 %v4264_v57, %v2596_v52 }
  0xca   :  { %v319_v60 = vsel %vm318_vm4, %v2420_v33, %v2431_v39  ;;  %v4272_v33 = vperm.slane %v2606_v31, 0 }
  0xcb   :  { %v2610_v15 = vadd.f32 %v297_v20, %v269_v0  ;;  %v95_v21 = vmul.f32 %v4263_v6, %v2596_v52  ;;  %v161_v25 = vadd.f32 %v153_v38, %v97_v44  ;;  %v4265_v20 = vperm.slane %v2556_v56, 0 }
  0xcc   :  { %v152_v0 = vmul.f32 %v4266_v50, %v2422_v34  ;;  %v322_v38 = vsel %vm318_vm4, %v2431_v39, %v2515_v11  ;;  %v2645_v50 = vld [vmem:[%s4206_s1 + $0x6] ss:$8 sm:$0xf]  ;;  %v300_v52 = vmul.f32 %v4275_v55, %v2478_v54 }
  0xcd   :  { %v151_v47 = vmul.f32 %v4265_v20, %v2422_v34  ;;  %v217_v44 = vadd.f32 %v209_v14, %v161_v25  ;;  %4267 = vst [vmem:[#allocation18_spill] sm:$0xff] %v2645_v50  ;;  %v2647_v34 = vmul.f32 %v328_v18, %v319_v60  ;;  %v2657_v20 = vmul.f32 %v329_v63, %v322_v38  ;;  %v2676_v38 = vld [vmem:[%s4206_s1 + $0x7] ss:$8 sm:$0xf] }
  0xce   :  { %v2636_v6 = vpop.permute.xlu2 %399  ;;  %v427_v57 = vpop.permute.xlu1 %426  ;;  %v160_v25 = vadd.f32 %v152_v0, %v96_v17  ;;  %v4269_v18 = vperm.slane %v2576_v9, 0  ;;  %v263_v0 = vmul.f32 %v4271_v16, %v2427_v36  ;;  %v264_v63 = vmul.f32 %v4272_v33, %v2427_v36 }
  0xcf   :  { %4268 = vst [vmem:[#allocation19_spill] sm:$0xff] %v2647_v34  ;;  %v159_v39 = vadd.f32 %v151_v47, %v95_v21  ;;  %v273_v29 = vadd.f32 %v265_v10, %v217_v44  ;;  %v4270_v21 = vperm.slane %v2569_v62, 0  ;;  %v384_v47 = vperm.slane %v2645_v50, 2 }
  0xd0   :  { %v2650_v14 = vpop.permute.xlu0 %484  ;;  %v207_v60 = vmul.f32 %v4269_v18, %v2442_v43  ;;  %v383_v10 = vperm.slane %v2645_v50, 1  ;;  %v2678_v18 = vmul.f32 %v327_v27, %v320_v61  ;;  %v4274_v33 = vperm.slane %v2538_v49, 1 }
  0xd1   :  { %v208_v17 = vmul.f32 %v4270_v21, %v2442_v43  ;;  %v309_v44 = vadd.f32 %v301_v3, %v273_v29  ;;  %v375_v21 = vsel %vm374_vm5, %v2440_v42, %v2486_v58  ;;  %v4230_v29 = vperm.slane %v2657_v20, 0  ;;  %v2695_v3 = vld [vmem:[%s4206_s1 + $0x20] ss:$8 sm:$0xf] }
  0xd2   :  { %4273 = vst [vmem:[#allocation20_spill] sm:$0xff] %v2678_v18  ;;  %v215_v16 = vadd.f32 %v207_v60, %v159_v39  ;;  %v299_v36 = vmul.f32 %v4274_v33, %v2478_v54  ;;  %v376_v27 = vsel %vm374_vm5, %v2517_v12, %v2440_v42  ;;  %v439_v39 = vperm.slane %v2676_v38, 1 }
  0xd3   :  { %v216_v43 = vadd.f32 %v208_v17, %v160_v25  ;;  %v2706_v55 = vmul.f32 %v384_v47, %v375_v21  ;;  %v440_v61 = vperm.slane %v2676_v38, 2  ;;  %v385_v42 = vperm.slane %v2645_v50, 3 }
  0xd4   :  { %v496_v11 = vperm.slane %v2695_v3, 2  ;;  %v271_v54 = vadd.f32 %v263_v0, %v215_v16  ;;  %v2719_v47 = vmul.f32 %v383_v10, %v376_v27  ;;  %v431_v21 = vsel %vm430_vm6, %v427_v57, %v2494_v1 }
  0xd5   :  { %v272_v12 = vadd.f32 %v264_v63, %v216_v43  ;;  %v432_v33 = vsel %vm430_vm6, %v2499_v5, %v427_v57  ;;  %v4278_v43 = vperm.slane %v2678_v18, 0  ;;  %v4279_v63 = vperm.slane %v2647_v34, 0 }
  0xd6   :  { %v2704_v25 = vpop.permute.xlu1 %343  ;;  %v495_v57 = vperm.slane %v2695_v3, 1  ;;  %v4240_v5 = vperm.slane %v2706_v55, 0  ;;  %v2749_v18 = vmul.f32 %v440_v61, %v431_v21 }
  0xd7   :  { %4276 = vst [vmem:[#allocation21_spill] sm:$0xff] %v2704_v25  ;;  %v357_v60 = vmul.f32 %v4230_v29, %v2704_v25  ;;  %v2712_v17 = vpop.permute.xlu2 %455  ;;  %v487_v29 = vsel %vm486_vm7, %v2572_v4, %v2650_v14  ;;  %v355_v0 = vmul.f32 %v4278_v43, %v2704_v25  ;;  %v356_v10 = vmul.f32 %v4279_v63, %v2704_v25 }
  0xd8   :  { %4277 = vst [vmem:[#allocation22_spill] sm:$0xff] %v2712_v17  ;;  %v2717_v45 = vpop.permute.xlu0 %366  ;;  %v308_v32 = vadd.f32 %v300_v52, %v272_v12  ;;  %v2747_v43 = vmul.f32 %v439_v39, %v432_v33  ;;  %v4242_v25 = vperm.slane %v2719_v47, 0  ;;  %v412_v52 = vmul.f32 %v4240_v5, %v2636_v6 }
  0xd9   :  { %v365_v50 = vadd.f32 %v357_v60, %v309_v44  ;;  %v378_v16 = vsel %vm374_vm5, %v2486_v58, %v2717_v45  ;;  %v2743_v44 = vmul.f32 %v496_v11, %v487_v29  ;;  %v307_v60 = vadd.f32 %v299_v36, %v271_v54 }
  0xda   :  { %v2741_v27 = vmul.f32 %v385_v42, %v378_v16  ;;  %v364_v58 = vadd.f32 %v356_v10, %v308_v32  ;;  %v441_v11 = vperm.slane %v2676_v38, 3  ;;  %v411_v12 = vmul.f32 %v4242_v25, %v2636_v6 }
  0xdb   :  { %v363_v34 = vadd.f32 %v355_v0, %v307_v60  ;;  %v4241_v32 = vperm.slane %v2743_v44, 0  ;;  %v4238_v33 = vperm.slane %v2747_v43, 0 }
  0xdc   :  { %v405_v63 = vperm.slane %v2741_v27, 0  ;;  %v420_v60 = vadd.f32 %v412_v52, %v364_v58 }
  0xdd   :  { %v419_v27 = vadd.f32 %v411_v12, %v363_v34 }
  0xde   :  { %v2753_v42 = vpop.permute.xlu1 %480  ;;  %v413_v36 = vmul.f32 %v405_v63, %v2636_v6 }
  0xdf   :  { %v488_v54 = vsel %vm486_vm7, %v2753_v42, %v2572_v4  ;;  %v4237_v4 = vperm.slane %v2749_v18, 0 }
  0xe0   :  { %v2768_v29 = vmul.f32 %v495_v57, %v488_v54  ;;  %v2770_v39 = vpop.permute.xlu0 %422  ;;  %v2772_v61 = vpop.permute.xlu2 %511  ;;  %v421_v21 = vadd.f32 %v413_v36, %v365_v50  ;;  %v467_v57 = vmul.f32 %v4238_v33, %v2712_v17  ;;  %v497_v36 = vperm.slane %v2695_v3, 3 }
  0xe1   :  { %v434_v0 = vsel %vm430_vm6, %v2494_v1, %v2770_v39  ;;  %v468_v54 = vmul.f32 %v4237_v4, %v2712_v17 }
  0xe2   :  { %v4239_v10 = vperm.slane %v2768_v29, 0  ;;  %v2781_v16 = vmul.f32 %v441_v11, %v434_v0  ;;  %v524_v11 = vmul.f32 %v4241_v32, %v2772_v61  ;;  %v475_v12 = vadd.f32 %v467_v57, %v419_v27 }
  0xe3   :  { %v476_v52 = vadd.f32 %v468_v54, %v420_v60  ;;  %v4280_v0 = vperm.slane %v2657_v20, 0 }
  0xe4   :  { %v461_v50 = vperm.slane %v2781_v16, 0  ;;  %v523_v1 = vmul.f32 %v4239_v10, %v2772_v61 }
  0xe5   :  { %v532_v5 = vadd.f32 %v524_v11, %v476_v52  ;;  %v4282_v11 = vperm.slane %v2554_v53, 0  ;;  %v4285_v53 = vperm.slane %v2566_v59, 0  ;;  %v4288_v59 = vperm.slane %v2606_v31, 0 }
  0xe6   :  { %v469_v34 = vmul.f32 %v461_v50, %v2712_v17  ;;  %v2797_v58 = vpop.permute.xlu1 %339  ;;  %v531_v10 = vadd.f32 %v523_v1, %v475_v12  ;;  %v2822_v1 = vperm.slane %v2451_v46, 0  ;;  %v4281_v46 = vperm.slane %v2556_v56, 0 }
  0xe7   :  { %v353_v16 = vmul.f32 %v4280_v0, %v2797_v58  ;;  %v178_v56 = vperm.slane %v2470_v51, 0  ;;  %v174_v51 = vsel %vm170_vm2, %v2412_v30, %v2407_v28  ;;  %v234_v28 = vperm.slane %v2504_v7, 0  ;;  %v4294_v7 = vld [vmem:[#allocation20_spill] sm:$0xff] }
  0xe8   :  { %v477_v4 = vadd.f32 %v469_v34, %v421_v21  ;;  %v2803_v33 = vpop.permute.xlu0 %478  ;;  %v148_v34 = vmul.f32 %v4282_v11, %v2424_v35  ;;  %v4289_v30 = vperm.slane %v2538_v49, 1 }
  0xe9   :  { %v490_v32 = vsel %vm486_vm7, %v2650_v14, %v2803_v33  ;;  %v2809_v25 = vpop.permute.xlu2 %543  ;;  %v361_v20 = vadd.f32 %v353_v16, %v2610_v15  ;;  %v122_v14 = vperm.slane %v2438_v41, 0  ;;  %v147_v15 = vmul.f32 %v4281_v46, %v2424_v35 }
  0xea   :  { %v2811_v17 = vmul.f32 %v497_v36, %v490_v32  ;;  %v551_v27 = vadd.f32 %v2809_v25, %v531_v10  ;;  %v552_v60 = vadd.f32 %v2809_v25, %v532_v5  ;;  %v61_v5 = vsel %vm57_vm1, %v2395_v22, %v2388_v19 }
  0xeb   :  { %v118_v41 = vsel %vm114_vm0, %v2429_v37, %v2397_v23  ;;  %v4283_v19 = vperm.slane %v2563_v24, 0  ;;  %v4284_v23 = vperm.slane %v2576_v9, 0  ;;  %v2861_v52 = vmul.f32 %v2822_v1, %v61_v5 }
  0xec   :  { %v517_v21 = vperm.slane %v2811_v17, 0  ;;  %v2817_v57 = vmax.f32 %v551_v27, 0.0  ;;  %v2819_v54 = vmax.f32 %v552_v60, 0.0  ;;  %v130_v0 = vmul.f32 %v122_v14, %v118_v41 }
  0xed   :  { %v91_v22 = vmul.f32 %v4283_v19, %v2401_v26  ;;  %v203_v37 = vmul.f32 %v4284_v23, %v2496_v2  ;;  %v4286_v24 = vperm.slane %v2569_v62, 0  ;;  %v260_v14 = vmul.f32 %v4288_v59, %v2574_v8 }
  0xee   :  { %v525_v32 = vmul.f32 %v517_v21, %v2772_v61  ;;  %834 = vrot.lane.b32.xlu0 %v2817_v57, %s2220_s2  ;;  %884 = vrot.lane.b32.xlu1 %v2817_v57, %s2221_s23  ;;  %v2879_v46 = vmul.f32 %v178_v56, %v174_v51  ;;  %v142_v62 = vperm.slane %v130_v0, 0  ;;  %v86_v11 = vperm.slane %v2861_v52, 0  ;;  %v4297_v51 = vld [vmem:[#allocation19_spill] sm:$0xff] }
  0xef   :  { %888 = vrot.lane.b32.xlu2 %v2819_v54, %s2221_s23  ;;  %v2845_v10 = vpop.permute.xlu1 %395  ;;  %v204_v16 = vmul.f32 %v4286_v24, %v2496_v2  ;;  %v155_v9 = vadd.f32 %v147_v15, %v91_v22  ;;  %v4292_v19 = vperm.slane %v2538_v49, 2  ;;  %v4295_v52 = vperm.slane %v4294_v7, 0  ;;  %v4296_v24 = vld [vmem:[#allocation4_spill] sm:$0xff] }
  0xf0   :  { %v2850_v36 = vadd.f32 %v525_v32, %v477_v4  ;;  %v409_v12 = vmul.f32 %v405_v63, %v2845_v10  ;;  %v92_v4 = vmul.f32 %v4285_v53, %v2401_v26  ;;  %v4287_v63 = vperm.slane %v2608_v48, 0  ;;  %v4304_v7 = vld [vmem:[#allocation12_spill] sm:$0xff] }
  0xf1   :  { %v211_v5 = vadd.f32 %v203_v37, %v155_v9  ;;  %v295_v48 = vmul.f32 %v4289_v30, %v2519_v13  ;;  %v296_v22 = vmul.f32 %v4292_v19, %v2519_v13  ;;  %v4293_v37 = vld [vmem:[#allocation17_spill] sm:$0xff]  ;;  %v351_v53 = vmul.f32 %v4295_v52, %v2797_v58 }
  0xf2   :  { %v259_v27 = vmul.f32 %v4287_v63, %v2574_v8  ;;  %v417_v60 = vadd.f32 %v409_v12, %v361_v20  ;;  %v156_v32 = vadd.f32 %v148_v34, %v92_v4  ;;  %v4290_v20 = vld [vmem:[#allocation3_spill] sm:$0xff]  ;;  %v94_v12 = vmul.f32 %v86_v11, %v4293_v37  ;;  %v4303_v37 = vld [vmem:[#allocation10_spill] sm:$0xff] }
  0xf3   :  { %v4291_v34 = vld [vmem:[#allocation7_spill] sm:$0xff]  ;;  %v198_v0 = vperm.slane %v2879_v46, 0  ;;  %v4298_v9 = vperm.slane %v4297_v51, 0  ;;  %v4299_v59 = vperm.slane %v2719_v47, 0  ;;  %v4302_v46 = vperm.slane %v2706_v55, 0 }
  0xf4   :  { %v212_v41 = vadd.f32 %v204_v16, %v156_v32  ;;  %v267_v15 = vadd.f32 %v259_v27, %v211_v5  ;;  %v230_v31 = vsel %vm226_vm3, %v4291_v34, %v4290_v20  ;;  %v150_v16 = vmul.f32 %v142_v62, %v4296_v24  ;;  %v4301_v20 = vld [vmem:[#allocation18_spill] sm:$0xff] }
  0xf5   :  { %v352_v63 = vmul.f32 %v4298_v9, %v2797_v58  ;;  %v242_v27 = vmul.f32 %v234_v28, %v230_v31  ;;  %v382_v34 = vperm.slane %v4301_v20, 0  ;;  %v408_v19 = vmul.f32 %v4302_v46, %v2845_v10  ;;  %v4306_v31 = vld [vmem:[#allocation13_spill] sm:$0xff]  ;;  %v4309_v9 = vld [vmem:[#allocation11_spill] sm:$0xff] }
  0xf6   :  { %v268_v56 = vadd.f32 %v260_v14, %v212_v41  ;;  %v303_v32 = vadd.f32 %v295_v48, %v267_v15  ;;  %v407_v14 = vmul.f32 %v4299_v59, %v2845_v10  ;;  %v4300_v41 = vld [vmem:[#allocation16_spill] sm:$0xff]  ;;  %v321_v28 = vsel %vm318_vm4, %v4304_v7, %v4303_v37 }
  0xf7   :  { %v326_v30 = vperm.slane %v4300_v41, 0  ;;  %v158_v48 = vadd.f32 %v150_v16, %v94_v12  ;;  %v4305_v47 = vperm.slane %v2747_v43, 0  ;;  %v4307_v55 = vperm.slane %v2749_v18, 0 }
  0xf8   :  { %v2893_v23 = vpop.permute.xlu1 %451  ;;  %v359_v15 = vadd.f32 %v351_v53, %v303_v32  ;;  %v254_v51 = vperm.slane %v242_v27, 0  ;;  %v438_v12 = vperm.slane %v2676_v38, 0  ;;  %v433_v43 = vsel %vm430_vm6, %v2770_v39, %v4309_v9  ;;  %v4312_v39 = vld [vmem:[#allocation5_spill] sm:$0xff] }
  0xf9   :  { %v465_v4 = vmul.f32 %v461_v50, %v2893_v23  ;;  %v304_v50 = vadd.f32 %v296_v22, %v268_v56  ;;  %v377_v22 = vsel %vm374_vm5, %v2717_v45, %v4306_v31  ;;  %v464_v52 = vmul.f32 %v4307_v55, %v2893_v23 }
  0xfa   :  { %v415_v53 = vadd.f32 %v407_v14, %v359_v15  ;;  %v334_v16 = vmul.f32 %v326_v30, %v321_v28  ;;  %v494_v32 = vperm.slane %v2695_v3, 0  ;;  %v390_v59 = vmul.f32 %v382_v34, %v377_v22 }
  0xfb   :  { %v473_v5 = vadd.f32 %v465_v4, %v417_v60  ;;  %v463_v60 = vmul.f32 %v4305_v47, %v2893_v23  ;;  %v360_v56 = vadd.f32 %v352_v63, %v304_v50  ;;  %v4308_v4 = vld [vmem:[#allocation6_spill] sm:$0xff]  ;;  %v489_v18 = vsel %vm486_vm7, %v2803_v33, %v2753_v42 }
  0xfc   :  { %v206_v24 = vmul.f32 %v198_v0, %v4308_v4  ;;  %v4310_v14 = vperm.slane %v2768_v29, 0  ;;  %v4311_v20 = vperm.slane %v2743_v44, 0  ;;  %v262_v46 = vmul.f32 %v254_v51, %v4312_v39  ;;  %v2949_v44 = vpop.permute.xlu0 %538 }
  0xfd   :  { %v416_v45 = vadd.f32 %v408_v19, %v360_v56  ;;  %v471_v27 = vadd.f32 %v463_v60, %v415_v53  ;;  %v286_v34 = vperm.slane %v2538_v49, 0  ;;  %v446_v19 = vmul.f32 %v438_v12, %v433_v43  ;;  %v4313_v49 = vld [vmem:[#allocation9_spill] sm:$0xff] }
  0xfe   :  { %v214_v63 = vadd.f32 %v206_v24, %v158_v48  ;;  %v146_v37 = vmul.f32 %v142_v62, %v2424_v35  ;;  %v346_v28 = vperm.slane %v334_v16, 0  ;;  %v402_v48 = vperm.slane %v390_v59, 0  ;;  %v4314_v62 = vld [vmem:[#allocation21_spill] sm:$0xff]  ;;  %v4315_v24 = vld [vmem:[#allocation22_spill] sm:$0xff] }
  0xff   :  { %v472_v38 = vadd.f32 %v464_v52, %v416_v45  ;;  %v502_v15 = vmul.f32 %v494_v32, %v489_v18  ;;  %v90_v17 = vmul.f32 %v86_v11, %v2401_v26  ;;  %v298_v60 = vmul.f32 %v286_v34, %v4313_v49 }
 0x100   :  { %v270_v29 = vadd.f32 %v262_v46, %v214_v63  ;;  %v202_v35 = vmul.f32 %v198_v0, %v2496_v2  ;;  %v354_v31 = vmul.f32 %v346_v28, %v4314_v62  ;;  %v258_v52 = vmul.f32 %v254_v51, %v2574_v8 }
 0x101   :  { %v508_v41 = vpop.permute.xlu1 %507  ;;  %v154_v22 = vadd.f32 %v146_v37, %v90_v17  ;;  %v410_v26 = vmul.f32 %v402_v48, %v2636_v6  ;;  %v514_v11 = vperm.slane %v502_v15, 0  ;;  %v294_v53 = vmul.f32 %v286_v34, %v2519_v13  ;;  %v3106_v15 = vld [vmem:[%s4206_s1 + $0x6] ss:$8 sm:$0xf] }
 0x102   :  { %v519_v30 = vmul.f32 %v4310_v14, %v508_v41  ;;  %v520_v50 = vmul.f32 %v4311_v20, %v508_v41  ;;  %v521_v3 = vmul.f32 %v517_v21, %v508_v41  ;;  %v306_v4 = vadd.f32 %v298_v60, %v270_v29 }
 0x103   :  { %v210_v2 = vadd.f32 %v202_v35, %v154_v22  ;;  %v522_v6 = vmul.f32 %v514_v11, %v2772_v61  ;;  %v350_v9 = vmul.f32 %v346_v28, %v2797_v58  ;;  %v406_v45 = vmul.f32 %v402_v48, %v2845_v10 }
 0x104   :  { %v527_v42 = vadd.f32 %v519_v30, %v471_v27  ;;  %v528_v33 = vadd.f32 %v520_v50, %v472_v38  ;;  %v2947_v7 = vadd.f32 %v521_v3, %v473_v5  ;;  %v458_v5 = vperm.slane %v446_v19, 0 }
 0x105   :  { %v362_v0 = vadd.f32 %v354_v31, %v306_v4  ;;  %v266_v8 = vadd.f32 %v258_v52, %v210_v2  ;;  %v518_v58 = vmul.f32 %v514_v11, %v508_v41  ;;  %v553_v41 = vadd.f32 %v2809_v25, %v2850_v36  ;;  %v3142_v52 = vld [vmem:[%s4206_s1 + $0x4] ss:$8 sm:$0xf] }
 0x106   :  { %v547_v21 = vadd.f32 %v2949_v44, %v527_v42  ;;  %v548_v47 = vadd.f32 %v2949_v44, %v528_v33  ;;  %v466_v12 = vmul.f32 %v458_v5, %v4315_v24  ;;  %v462_v13 = vmul.f32 %v458_v5, %v2893_v23 }
 0x107   :  { %v418_v51 = vadd.f32 %v410_v26, %v362_v0  ;;  %v302_v32 = vadd.f32 %v294_v53, %v266_v8  ;;  %v3019_v14 = vmax.f32 %v553_v41, 0.0  ;;  %v549_v30 = vadd.f32 %v2949_v44, %v2947_v7 }
 0x108   :  { %v2957_v56 = vmax.f32 %v547_v21, 0.0  ;;  %v2959_v55 = vmax.f32 %v548_v47, 0.0  ;;  %v3117_v21 = vld [vmem:[%s4206_s1 + $0x5] ss:$8 sm:$0xf]  ;;  %v855_v49 = vperm.slane %v3106_v15, 1 }
 0x109   :  { %v474_v16 = vadd.f32 %v466_v12, %v418_v51  ;;  %v358_v63 = vadd.f32 %v350_v9, %v302_v32  ;;  %v3029_v20 = vmax.f32 %v549_v30, 0.0  ;;  %v805_v31 = vperm.slane %v3117_v21, 1 }
 0x10a   :  { %836 = vrot.lane.b32.xlu0 %v2959_v55, %s2220_s2  ;;  %886 = vrot.lane.b32.xlu2 %v2959_v55, %s2221_s23  ;;  %v755_v12 = vperm.slane %v3142_v52, 1 }
 0x10b   :  { %882 = vrot.lane.b32.xlu1 %v2957_v56, %s2221_s23  ;;  %v530_v43 = vadd.f32 %v522_v6, %v474_v16  ;;  %v414_v59 = vadd.f32 %v406_v45, %v358_v63 }
 0x10c   :  { %v767_v6 = vmul.f32 %v755_v12, %v2817_v57  ;;  %v763_v16 = vmul.f32 %v755_v12, %v2957_v56 }
 0x10d   :  { %v550_v61 = vadd.f32 %v2809_v25, %v530_v43  ;;  %v470_v18 = vadd.f32 %v462_v13, %v414_v59  ;;  %v3052_v25 = vld [vmem:[%s4206_s1 + $0x7] ss:$8 sm:$0xf] }
 0x10e   :  { %v905_v50 = vperm.slane %v3052_v25, 1  ;;  %v904_v26 = vperm.slane %v3052_v25, 0  ;;  %v907_v63 = vperm.slane %v3052_v25, 3 }
 0x10f   :  { %v2982_v27 = vmax.f32 %v550_v61, 0.0  ;;  %v526_v10 = vadd.f32 %v518_v58, %v470_v18 }
 0x111   :  { %v546_v23 = vadd.f32 %v2949_v44, %v526_v10  ;;  %v854_v10 = vperm.slane %v3106_v15, 0 }
 0x112   :  { %788 = vrot.lane.b32.xlu0 %v2819_v54, %s2216_s22  ;;  %832 = vrot.lane.b32.xlu2 %v2957_v56, %s2220_s2 }
 0x113   :  { %838 = vrot.lane.b32.xlu1 %v2819_v54, %s2220_s2  ;;  %v2991_v38 = vmax.f32 %v546_v23, 0.0 }
 0x11a   :  { %786 = vrot.lane.b32.xlu0 %v2959_v55, %s2216_s22  ;;  %784 = vrot.lane.b32.xlu2 %v2817_v57, %s2216_s22 }
 0x11b   :  { %880 = vrot.lane.b32.xlu1 %v2982_v27, %s2221_s23 }
 0x122   :  { %934 = vrot.lane.b32.xlu0 %v2817_v57, %s2224_s24  ;;  %782 = vrot.lane.b32.xlu2 %v2957_v56, %s2216_s22 }
 0x123   :  { %878 = vrot.lane.b32.xlu1 %v2991_v38, %s2221_s23 }
 0x12a   :  { %932 = vrot.lane.b32.xlu0 %v2957_v56, %s2224_s24  ;;  %828 = vrot.lane.b32.xlu2 %v2991_v38, %s2220_s2 }
 0x12b   :  { %830 = vrot.lane.b32.xlu1 %v2982_v27, %s2220_s2 }
 0x132   :  { %708 = vrot.lane.b32.xlu0 %v2817_v57, %s2215_s17  ;;  %780 = vrot.lane.b32.xlu2 %v2982_v27, %s2216_s22 }
 0x133   :  { %938 = vrot.lane.b32.xlu1 %v2819_v54, %s2224_s24 }
 0x13a   :  { %702 = vrot.lane.b32.xlu0 %v2991_v38, %s2215_s17  ;;  %704 = vrot.lane.b32.xlu2 %v2982_v27, %s2215_s17 }
 0x13b   :  { %936 = vrot.lane.b32.xlu1 %v2959_v55, %s2224_s24 }
 0x142   :  { %654 = vrot.lane.b32.xlu0 %v2982_v27, %s2214_s0  ;;  %892 = vrot.lane.b32.xlu2 %v3019_v14, %s2221_s23 }
 0x143   :  { %778 = vrot.lane.b32.xlu1 %v2991_v38, %s2216_s22 }
 0x149   :  { %v3054_v36 = vpop.permute.xlu2 %888 }
 0x14a   :  { %652 = vrot.lane.b32.xlu0 %v2991_v38, %s2214_s0  ;;  %890 = vrot.lane.b32.xlu2 %v3029_v20, %s2221_s23 }
 0x14b   :  { %706 = vrot.lane.b32.xlu1 %v2957_v56, %s2215_s17 }
 0x152   :  { %840 = vrot.lane.b32.xlu0 %v3029_v20, %s2220_s2  ;;  %842 = vrot.lane.b32.xlu2 %v3019_v14, %s2220_s2 }
 0x153   :  { %658 = vrot.lane.b32.xlu1 %v2817_v57, %s2214_s0 }
 0x15a   :  { %714 = vrot.lane.b32.xlu0 %v3029_v20, %s2215_s17  ;;  %716 = vrot.lane.b32.xlu2 %v3019_v14, %s2215_s17 }
 0x15b   :  { %656 = vrot.lane.b32.xlu1 %v2957_v56, %s2214_s0 }
 0x160   :  { %v885_v3 = vpop.permute.xlu1 %884  ;;  %v3082_v37 = vpop.permute.xlu0 %834 }
 0x161   :  { %v897_v39 = vsel %vm430_vm6, %v885_v3, %v3054_v36 }
 0x162   :  { %606 = vrot.lane.b32.xlu0 %v2957_v56, %s2212_s16  ;;  %608 = vrot.lane.b32.xlu2 %v2817_v57, %s2212_s16  ;;  %v917_v46 = vmul.f32 %v905_v50, %v897_v39  ;;  %v3206_v39 = vld [vmem:[%s4206_s1 + $0x3] ss:$8 sm:$0xf] }
 0x163   :  { %604 = vrot.lane.b32.xlu1 %v2982_v27, %s2212_s16 }
 0x164   :  { %1119 = vmatpush.msra.mxu2 %v917_v46  ;;  %v3066_v34 = vpop.permute.xlu2 %886 }
 0x16a   :  { %564 = vrot.lane.b32.xlu0 %v2982_v27, %s2211_s15  ;;  %602 = vrot.lane.b32.xlu2 %v2991_v38, %s2212_s16 }
 0x16b   :  { %792 = vrot.lane.b32.xlu1 %v3019_v14, %s2216_s22 }
 0x16c   :  { %v3074_v19 = vpop.permute.xlu2 %832 }
 0x172   :  { %942 = vrot.lane.b32.xlu0 %v3019_v14, %s2224_s24  ;;  %790 = vrot.lane.b32.xlu2 %v3029_v20, %s2216_s22 }
 0x173   :  { %666 = vrot.lane.b32.xlu1 %v3019_v14, %s2214_s0 }
 0x174   :  { %v3084_v42 = vpop.permute.xlu2 %784 }
 0x17a   :  { %616 = vrot.lane.b32.xlu0 %v3019_v14, %s2212_s16  ;;  %664 = vrot.lane.b32.xlu2 %v3029_v20, %s2214_s0 }
 0x17b   :  { %568 = vrot.lane.b32.xlu1 %v2817_v57, %s2211_s15 }
 0x17c   :  { %v3092_v33 = vpop.permute.xlu2 %782  ;;  %v3094_v7 = vpop.permute.xlu0 %836 }
 0x17d   :  { %v883_v28 = vpop.permute.xlu1 %882  ;;  %v846_v60 = vsel %vm374_vm5, %v3074_v19, %v3094_v7 }
 0x17e   :  { %v896_v29 = vsel %vm430_vm6, %v883_v28, %v3066_v34  ;;  %v863_v22 = vmul.f32 %v855_v49, %v846_v60 }
 0x17f   :  { %v913_v48 = vmul.f32 %v905_v50, %v896_v29  ;;  %v1055_v50 = vld [vmem:[%s4207_s5 + $0x8] sm:$0xff] }
 0x181   :  { %1120 = vmatpush.msra.mxu2 %v913_v48 }
 0x182   :  { %712 = vrot.lane.b32.xlu0 %v2819_v54, %s2215_s17  ;;  %566 = vrot.lane.b32.xlu2 %v2957_v56, %s2211_s15  ;;  %v906_v56 = vperm.slane %v3052_v25, 2 }
 0x183   :  { %562 = vrot.lane.b32.xlu1 %v2991_v38, %s2211_s15 }
 0x184   :  { %v3110_v44 = vpop.permute.xlu2 %828  ;;  %v3112_v17 = vpop.permute.xlu0 %788 }
 0x185   :  { %v3119_v47 = vpop.permute.xlu1 %838  ;;  %v797_v5 = vsel %vm318_vm4, %v3084_v42, %v3112_v17  ;;  %v848_v23 = vsel %vm374_vm5, %v3110_v44, %v3074_v19  ;;  %v3215_v19 = vld [vmem:[%s4206_s1 + $0x20] ss:$8 sm:$0xf] }
 0x186   :  { %v847_v35 = vsel %vm374_vm5, %v3082_v37, %v3119_v47  ;;  %v817_v4 = vmul.f32 %v805_v31, %v797_v5 }
 0x187   :  { %v867_v62 = vmul.f32 %v855_v49, %v847_v35 }
 0x189   :  { %1121 = vmatpush.msra.mxu2 %v867_v62 }
 0x18a   :  { %930 = vrot.lane.b32.xlu0 %v2982_v27, %s2224_s24  ;;  %614 = vrot.lane.b32.xlu2 %v3029_v20, %s2212_s16 }
 0x18b   :  { %940 = vrot.lane.b32.xlu1 %v3029_v20, %s2224_s24  ;;  %1122 = vmatpush.msra.mxu2 %v863_v22 }
 0x18c   :  { %v3147_v11 = vpop.permute.xlu2 %780  ;;  %v3149_v2 = vpop.permute.xlu0 %786 }
 0x18d   :  { %v881_v0 = vpop.permute.xlu1 %880  ;;  %1123 = vmatpush.msra.mxu2 %v817_v4  ;;  %v796_v24 = vsel %vm318_vm4, %v3092_v33, %v3149_v2  ;;  %v799_v46 = vsel %vm318_vm4, %v3147_v11, %v3084_v42  ;;  %v955_v42 = vperm.slane %v3215_v19, 1 }
 0x18e   :  { %v899_v53 = vsel %vm430_vm6, %v881_v0, %v885_v3  ;;  %v813_v8 = vmul.f32 %v805_v31, %v796_v24  ;;  %v804_v3 = vperm.slane %v3117_v21, 0  ;;  %v856_v24 = vperm.slane %v3106_v15, 2 }
 0x18f   :  { %v916_v51 = vmul.f32 %v904_v26, %v899_v53 }
 0x190   :  { %1124 = vmatpush.msra.mxu2 %v813_v8  ;;  %v816_v29 = vmul.f32 %v804_v3, %v799_v46 }
 0x191   :  { %1073 = vmatpush.msra.mxu0 %v916_v51 }
 0x192   :  { %928 = vrot.lane.b32.xlu0 %v2991_v38, %s2224_s24  ;;  %710 = vrot.lane.b32.xlu2 %v2959_v55, %s2215_s17 }
 0x193   :  { %576 = vrot.lane.b32.xlu1 %v3019_v14, %s2211_s15  ;;  %1125 = vmatpush.msra.mxu2 %v767_v6 }
 0x194   :  { %v3166_v9 = vpop.permute.xlu2 %704  ;;  %v3168_v43 = vpop.permute.xlu0 %934 }
 0x195   :  { %v879_v32 = vpop.permute.xlu1 %878  ;;  %1126 = vmatpush.msra.mxu2 %v763_v16 }
 0x196   :  { %v898_v57 = vsel %vm430_vm6, %v879_v32, %v883_v28  ;;  %v729_v28 = vperm.slane %v3206_v39, 1 }
 0x197   :  { %v912_v45 = vmul.f32 %v904_v26, %v898_v57 }
 0x199   :  { %1074 = vmatpush.msra.mxu0 %v912_v45 }
 0x19a   :  { %610 = vrot.lane.b32.xlu0 %v2959_v55, %s2212_s16  ;;  %662 = vrot.lane.b32.xlu2 %v2819_v54, %s2214_s0 }
 0x19b   :  { %574 = vrot.lane.b32.xlu1 %v3029_v20, %s2211_s15 }
 0x19c   :  { %v893_v13 = vpop.permute.xlu2 %892  ;;  %v3180_v61 = vpop.permute.xlu0 %932 }
 0x19d   :  { %v895_v59 = vsel %vm430_vm6, %v3054_v36, %v893_v13  ;;  %v901_v58 = vsel %vm430_vm6, %v893_v13, %v881_v0  ;;  %v831_v18 = vpop.permute.xlu1 %830  ;;  %v857_v0 = vperm.slane %v3106_v15, 3 }
 0x19e   :  { %v3192_v41 = vmul.f32 %v907_v63, %v901_v58  ;;  %v849_v30 = vsel %vm374_vm5, %v831_v18, %v3082_v37  ;;  %v3197_v25 = vmul.f32 %v906_v56, %v895_v59  ;;  %v862_v37 = vmul.f32 %v854_v10, %v848_v23 }
 0x19f   :  { %v866_v36 = vmul.f32 %v854_v10, %v849_v30 }
 0x1a1   :  { %1075 = vmatpush.msra.mxu0 %v866_v36 }
 0x1a2   :  { %1063 = vperm.xlu0 %2200, %v1055_v50   ;;  %612 = vrot.lane.b32.xlu2 %v2819_v54, %s2212_s16 }
 0x1a3   :  { %660 = vrot.lane.b32.xlu1 %v2959_v55, %s2214_s0  ;;  %1076 = vmatpush.msra.mxu0 %v862_v37 }
 0x1a4   :  { %v891_v48 = vpop.permute.xlu2 %890  ;;  %v3223_v49 = vpop.permute.xlu0 %708 }
 0x1a5   :  { %v894_v60 = vsel %vm430_vm6, %v3066_v34, %v891_v48  ;;  %v900_v35 = vsel %vm430_vm6, %v891_v48, %v879_v32  ;;  %v3230_v62 = vpop.permute.xlu1 %938  ;;  %1077 = vmatpush.msra.mxu0 %v816_v29  ;;  %v723_v31 = vsel %vm226_vm3, %v3166_v9, %v3223_v49 }
 0x1a6   :  { %v3236_v5 = vmul.f32 %v907_v63, %v900_v35  ;;  %v741_v22 = vmul.f32 %v729_v28, %v723_v31  ;;  %v947_v4 = vsel %vm486_vm7, %v3168_v43, %v3230_v62  ;;  %v3242_v34 = vmul.f32 %v906_v56, %v894_v60 }
 0x1a7   :  { %v967_v26 = vmul.f32 %v955_v42, %v947_v4  ;;  %v754_v56 = vperm.slane %v3142_v52, 0 }
 0x1a8   :  { %1127 = vmatpush.msra.mxu2 %v741_v22 }
 0x1a9   :  { %1156 = vmatpush.msra.mxu3 %v967_v26  ;;  %v766_v58 = vmul.f32 %v754_v56, %v2982_v27  ;;  %v762_v23 = vmul.f32 %v754_v56, %v2991_v38 }
 0x1aa   :  { %570 = vrot.lane.b32.xlu2 %v2959_v55, %s2211_s15 }
 0x1ab   :  { %572 = vrot.lane.b32.xlu1 %v2819_v54, %s2211_s15 }
 0x1ac   :  { %v843_v12 = vpop.permute.xlu2 %842  ;;  %v703_v53 = vpop.permute.xlu0 %702 }
 0x1ad   :  { %v845_v8 = vsel %vm374_vm5, %v3119_v47, %v843_v12  ;;  %v851_v51 = vsel %vm374_vm5, %v843_v12, %v831_v18  ;;  %v3255_v6 = vpop.permute.xlu1 %936  ;;  %v728_v18 = vperm.slane %v3206_v39, 0 }
 0x1ae   :  { %v3257_v16 = vmul.f32 %v857_v0, %v851_v51  ;;  %v946_v15 = vsel %vm486_vm7, %v3180_v61, %v3255_v6  ;;  %v3263_v32 = vmul.f32 %v856_v24, %v845_v8 }
 0x1af   :  { %v963_v57 = vmul.f32 %v955_v42, %v946_v15 }
 0x1b1   :  { %1157 = vmatpush.msra.mxu3 %v963_v57 }
 0x1b4   :  { %v3265_v45 = vpop.permute.xlu2 %716  ;;  %v3267_v63 = vpop.permute.xlu0 %654 }
 0x1b5   :  { %v3269_v47 = vpop.permute.xlu1 %778  ;;  %v725_v10 = vsel %vm226_vm3, %v3265_v45, %v3166_v9  ;;  %v3293_v9 = vld [vmem:[%s4206_s1 + $0x2] ss:$8 sm:$0xf] }
 0x1b6   :  { %v798_v13 = vsel %vm318_vm4, %v3269_v47, %v3092_v33  ;;  %v740_v33 = vmul.f32 %v728_v18, %v725_v10  ;;  %v679_v38 = vperm.slane %v3293_v9, 1 }
 0x1b7   :  { %v812_v59 = vmul.f32 %v804_v3, %v798_v13 }
 0x1b9   :  { %1078 = vmatpush.msra.mxu0 %v812_v59 }
 0x1bb   :  { %1079 = vmatpush.msra.mxu0 %v766_v58  ;;  %v3343_v58 = vld [vmem:[%s4208_s4 + $0x8] sm:$0xff] }
 0x1bc   :  { %v3283_v30 = vpop.permute.xlu2 %608  ;;  %v653_v36 = vpop.permute.xlu0 %652  ;;  %2141 = vmatmul.msk.f32.vlgmr.msra.gmra.mxu3 %vm1066_vm8, %v3343_v58 }
 0x1bd   :  { %v3285_v50 = vpop.permute.xlu1 %706  ;;  %1080 = vmatpush.msra.mxu0 %v762_v23 }
 0x1be   :  { %v722_v27 = vsel %vm226_vm3, %v703_v53, %v3285_v50 }
 0x1bf   :  { %1081 = vmatpush.msra.mxu0 %v740_v33  ;;  %v737_v3 = vmul.f32 %v729_v28, %v722_v27  ;;  %v956_v33 = vperm.slane %v3215_v19, 2  ;;  %v3357_v27 = vld [vmem:[%s4208_s4 + $0x18] sm:$0xff] }
 0x1c1   :  { %1128 = vmatpush.msra.mxu2 %v737_v3 }
 0x1c4   :  { %v603_v46 = vpop.permute.xlu2 %602  ;;  %v841_v37 = vpop.permute.xlu0 %840  ;;  %2142 = vmatmul.msk.f32.gmra.mxu3 %vm1066_vm8, %v3357_v27 }
 0x1c5   :  { %v3296_v29 = vpop.permute.xlu1 %658  ;;  %v844_v42 = vsel %vm374_vm5, %v3094_v7, %v841_v37  ;;  %v850_v28 = vsel %vm374_vm5, %v841_v37, %v3110_v44 }
 0x1c6   :  { %v673_v48 = vsel %vm170_vm2, %v3267_v63, %v3296_v29  ;;  %v3308_v60 = vmul.f32 %v857_v0, %v850_v28  ;;  %v3310_v35 = vmul.f32 %v856_v24, %v844_v42  ;;  %v3327_v24 = vld [vmem:[%s4206_s1 + $0x1] ss:$8 sm:$0xf]  ;;  %v678_v28 = vperm.slane %v3293_v9, 0 }
 0x1c7   :  { %v691_v31 = vmul.f32 %v679_v38, %v673_v48  ;;  %v629_v8 = vperm.slane %v3327_v24, 1 }
 0x1c9   :  { %1129 = vmatpush.msra.mxu2 %v691_v31 }
 0x1cc   :  { %v3312_v22 = vpop.permute.xlu2 %790  ;;  %v3314_v4 = vpop.permute.xlu0 %714 }
 0x1cd   :  { %v3316_v7 = vpop.permute.xlu1 %656  ;;  %v724_v44 = vsel %vm226_vm3, %v3314_v4, %v703_v53 }
 0x1ce   :  { %v672_v26 = vsel %vm170_vm2, %v653_v36, %v3316_v7  ;;  %v736_v0 = vmul.f32 %v728_v18, %v724_v44 }
 0x1cf   :  { %v687_v12 = vmul.f32 %v679_v38, %v672_v26 }
 0x1d0   :  { %1082 = vmatpush.msra.mxu0 %v736_v0 }
 0x1d1   :  { %1130 = vmatpush.msra.mxu2 %v687_v12 }
 0x1d4   :  { %v3330_v51 = vpop.permute.xlu2 %664  ;;  %v3332_v15 = vpop.permute.xlu0 %606 }
 0x1d5   :  { %v605_v53 = vpop.permute.xlu1 %604  ;;  %v622_v56 = vsel %vm114_vm0, %v603_v46, %v3332_v15  ;;  %v674_v48 = vsel %vm170_vm2, %v3330_v51, %v653_v36 }
 0x1d6   :  { %v623_v57 = vsel %vm114_vm0, %v605_v53, %v3283_v30  ;;  %v637_v59 = vmul.f32 %v629_v8, %v622_v56  ;;  %v686_v0 = vmul.f32 %v678_v28, %v674_v48 }
 0x1d7   :  { %v641_v13 = vmul.f32 %v629_v8, %v623_v57  ;;  %v628_v8 = vperm.slane %v3327_v24, 0 }
 0x1d9   :  { %1131 = vmatpush.msra.mxu2 %v641_v13 }
 0x1db   :  { %1132 = vmatpush.msra.mxu2 %v637_v59  ;;  %v4317_v59 = vld [vmem:[#allocation14_spill] sm:$0xff] }
 0x1dc   :  { %v3347_v18 = vpop.permute.xlu2 %566  ;;  %v3349_v10 = vpop.permute.xlu0 %564 }
 0x1dd   :  { %4316 = vst [vmem:[#allocation3_spill] sm:$0xff] %v3347_v18  ;;  %v3351_v23 = vpop.permute.xlu1 %792 }
 0x1e4   :  { %v3361_v3 = vpop.permute.xlu2 %614  ;;  %v3363_v38 = vpop.permute.xlu0 %942 }
 0x1e5   :  { %v3365_v37 = vpop.permute.xlu1 %666  ;;  %v945_v42 = vsel %vm486_vm7, %v3230_v62, %v3363_v38  ;;  %v624_v36 = vsel %vm114_vm0, %v3361_v3, %v603_v46  ;;  %v4244_v46 = vperm.slane %v3293_v9, 2 }
 0x1e6   :  { %v675_v31 = vsel %vm170_vm2, %v3365_v37, %v3267_v63  ;;  %v968_v44 = vmul.f32 %v956_v33, %v945_v42 }
 0x1e7   :  { %v690_v26 = vmul.f32 %v678_v28, %v675_v31  ;;  %v636_v28 = vmul.f32 %v628_v8, %v624_v36 }
 0x1e8   :  { %1202 = vmatpush.msrb.mxu3 %v968_v44 }
 0x1e9   :  { %1083 = vmatpush.msra.mxu0 %v690_v26 }
 0x1eb   :  { %1084 = vmatpush.msra.mxu0 %v686_v0 }
 0x1ec   :  { %v3379_v12 = vpop.permute.xlu2 %710  ;;  %v3381_v62 = vpop.permute.xlu0 %616 }
 0x1ed   :  { %v3387_v57 = vpop.permute.xlu1 %568  ;;  %v625_v63 = vsel %vm114_vm0, %v3381_v62, %v605_v53 }
 0x1ee   :  { %v583_v56 = vsel %vm57_vm1, %v3349_v10, %v3387_v57  ;;  %v640_v13 = vmul.f32 %v628_v8, %v625_v63  ;;  %v3416_v8 = vld [vmem:[%s4208_s4] sm:$0xff] }
 0x1ef   :  { %v591_v42 = vmul.f32 %v583_v56, %v4317_v59  ;;  %v1054_v63 = vld [vmem:[%s4207_s5] sm:$0xff]  ;;  %v630_v56 = vperm.slane %v3327_v24, 2 }
 0x1f0   :  { %1085 = vmatpush.msra.mxu0 %v640_v13  ;;  %1058 = vperm.xlu1 %2209, %v1054_v63   ;;  %v3443_v63 = vld [vmem:[%s4208_s4 + $0x10] sm:$0xff] }
 0x1f1   :  { %1133 = vmatpush.msra.mxu2 %v591_v42 }
 0x1f2   :  { %1086 = vmatpush.msra.mxu0 %v636_v28 }
 0x1f4   :  { %v3398_v48 = vpop.permute.xlu2 %662  ;;  %v3400_v31 = vpop.permute.xlu0 %712 }
 0x1f5   :  { %v671_v53 = vsel %vm170_vm2, %v3296_v29, %v3398_v48  ;;  %v3406_v44 = vpop.permute.xlu1 %562  ;;  %v954_v29 = vperm.slane %v3215_v19, 0 }
 0x1f6   :  { %v582_v26 = vsel %vm57_vm1, %v3406_v44, %v3347_v18  ;;  %v3420_v36 = vmul.f32 %v4244_v46, %v671_v53 }
 0x1f7   :  { %v587_v0 = vmul.f32 %v582_v26, %v4317_v59 }
 0x1f9   :  { %1134 = vmatpush.msra.mxu2 %v587_v0 }
 0x1fa   :  { %1135 = vmatmul.f32.vlgmr.msra.gmra.mxu2 %v3416_v8 }
 0x1fc   :  { %v3428_v13 = vpop.permute.xlu2 %612  ;;  %v931_v59 = vpop.permute.xlu0 %930 }
 0x1fd   :  { %v621_v42 = vsel %vm114_vm0, %v3283_v30, %v3428_v13  ;;  %v941_v28 = vpop.permute.xlu1 %940  ;;  %v949_v53 = vsel %vm486_vm7, %v931_v59, %v3168_v43 }
 0x1fe   :  { %v944_v26 = vsel %vm486_vm7, %v3255_v6, %v941_v28  ;;  %v966_v0 = vmul.f32 %v954_v29, %v949_v53  ;;  %v3445_v18 = vmul.f32 %v630_v56, %v621_v42  ;;  %v801_v6 = vsel %vm318_vm4, %v3351_v23, %v3147_v11 }
 0x1ff   :  { %v964_v46 = vmul.f32 %v956_v33, %v944_v26  ;;  %v800_v11 = vsel %vm318_vm4, %v3312_v22, %v3269_v47  ;;  %v731_v26 = vperm.slane %v3206_v39, 3 }
 0x200   :  { %1110 = vmatpush.msra.mxu1 %v966_v0 }
 0x201   :  { %1203 = vmatpush.msrb.mxu3 %v964_v46  ;;  %v807_v46 = vperm.slane %v3117_v21, 3 }
 0x202   :  { %1138 = vmatmul.f32.gmra.mxu2 %v3443_v63  ;;  %2143 = vmatmul.msk.f32.vlgmr.msrb.gmra.mxu3 %vm1066_vm8, %v3343_v58 }
 0x203   :  { %1211 = vmatpush.msra.mxu3 %v3192_v41  ;;  %v819_v53 = vmul.f32 %v807_v46, %v801_v6 }
 0x204   :  { %v929_v43 = vpop.permute.xlu0 %928 }
 0x205   :  { %1212 = vmatpush.msra.mxu3 %v3236_v5  ;;  %v3456_v30 = vpop.permute.xlu1 %576  ;;  %v948_v33 = vsel %vm486_vm7, %v929_v43, %v3180_v61  ;;  %v757_v61 = vperm.slane %v3142_v52, 3 }
 0x206   :  { %v585_v41 = vsel %vm57_vm1, %v3456_v30, %v3349_v10  ;;  %v962_v5 = vmul.f32 %v954_v29, %v948_v33  ;;  %v815_v10 = vmul.f32 %v807_v46, %v800_v11  ;;  %v806_v29 = vperm.slane %v3117_v21, 2  ;;  %v4319_v11 = vld [vmem:[#allocation8_spill] sm:$0xff] }
 0x207   :  { %1213 = vmatpush.msra.mxu3 %v3257_v16  ;;  %v590_v42 = vmul.f32 %v585_v41, %v2822_v1  ;;  %v795_v16 = vsel %vm318_vm4, %v3112_v17, %v3351_v23  ;;  %v951_v21 = vsel %vm486_vm7, %v3363_v38, %v931_v59  ;;  %v681_v23 = vperm.slane %v3293_v9, 3 }
 0x208   :  { %1111 = vmatpush.msra.mxu1 %v962_v5  ;;  %v730_v33 = vperm.slane %v3206_v39, 2 }
 0x209   :  { %1214 = vmatpush.msra.mxu3 %v3308_v60  ;;  %1087 = vmatpush.msra.mxu0 %v590_v42  ;;  %v769_v60 = vmul.f32 %v757_v61, %v3019_v14  ;;  %v957_v14 = vperm.slane %v3215_v19, 3  ;;  %v718_v19 = vsel %vm226_vm3, %v3379_v12, %v3314_v4 }
 0x20a   :  { %1165 = vmatpush.msrb.mxu1 %v3197_v25  ;;  %2144 = vmatmul.msk.f32.gmra.mxu3 %vm1066_vm8, %v3357_v27  ;;  %v765_v25 = vmul.f32 %v757_v61, %v3029_v20  ;;  %v794_v20 = vsel %vm318_vm4, %v3149_v2, %v3312_v22  ;;  %v756_v22 = vperm.slane %v3142_v52, 2 }
 0x20b   :  { %1215 = vmatpush.msra.mxu3 %v819_v53  ;;  %2139 = vmatmul.msk.f32.vlgmr.msra.gmra.mxu1 %vm1066_vm8, %v3343_v58  ;;  %v814_v4 = vmul.f32 %v806_v29, %v794_v20 }
 0x20c   :  { %1166 = vmatpush.msrb.mxu1 %v3242_v34  ;;  %v611_v47 = vpop.permute.xlu0 %610  ;;  %v719_v34 = vsel %vm226_vm3, %v3400_v31, %v3265_v45  ;;  %v768_v59 = vmul.f32 %v756_v22, %v2819_v54  ;;  %v764_v6 = vmul.f32 %v756_v22, %v2959_v55  ;;  %v720_v54 = vsel %vm226_vm3, %v3285_v50, %v3379_v12 }
 0x20d   :  { %1216 = vmatpush.msra.mxu3 %v815_v10  ;;  %v3492_v0 = vpop.permute.xlu1 %574  ;;  %v620_v17 = vsel %vm114_vm0, %v3332_v15, %v611_v47  ;;  %v743_v38 = vmul.f32 %v731_v26, %v719_v34  ;;  %v618_v39 = vsel %vm114_vm0, %v611_v47, %v3361_v3  ;;  %v738_v50 = vmul.f32 %v730_v33, %v720_v54 }
 0x20e   :  { %1167 = vmatpush.msrb.mxu1 %v3263_v32  ;;  %v584_v45 = vsel %vm57_vm1, %v3492_v0, %v3406_v44  ;;  %v3510_v15 = vmul.f32 %v630_v56, %v620_v17  ;;  %v818_v32 = vmul.f32 %v806_v29, %v795_v16  ;;  %v950_v44 = vsel %vm486_vm7, %v941_v28, %v929_v43 }
 0x20f   :  { %1217 = vmatpush.msra.mxu3 %v769_v60  ;;  %v586_v2 = vmul.f32 %v584_v45, %v2822_v1  ;;  %v669_v56 = vsel %vm170_vm2, %v3398_v48, %v3365_v37  ;;  %v739_v1 = vmul.f32 %v731_v26, %v718_v19  ;;  %v965_v52 = vmul.f32 %v957_v14, %v950_v44 }
 0x210   :  { %1168 = vmatpush.msrb.mxu1 %v3310_v35  ;;  %v969_v35 = vmul.f32 %v957_v14, %v951_v21  ;;  %v693_v28 = vmul.f32 %v681_v23, %v669_v56  ;;  %v721_v43 = vsel %vm226_vm3, %v3223_v49, %v3400_v31  ;;  %v631_v37 = vperm.slane %v3327_v24, 3 }
 0x211   :  { %1218 = vmatpush.msra.mxu3 %v765_v25  ;;  %1088 = vmatpush.msra.mxu0 %v586_v2  ;;  %v619_v49 = vsel %vm114_vm0, %v3428_v13, %v3381_v62  ;;  %v742_v55 = vmul.f32 %v730_v33, %v721_v43  ;;  %v4318_v3 = vperm.slane %v3293_v9, 2  ;;  %v4320_v9 = vld [vmem:[#allocation3_spill] sm:$0xff] }
 0x212   :  { %1169 = vmatpush.msrb.mxu1 %v818_v32  ;;  %1089 = vmatmul.f32.vlgmr.msra.gmra.mxu0 %v3416_v8  ;;  %v643_v46 = vmul.f32 %v631_v37, %v619_v49  ;;  %v639_v62 = vmul.f32 %v631_v37, %v618_v39 }
 0x213   :  { %1219 = vmatpush.msra.mxu3 %v743_v38  ;;  %1248 = vmatpush.msrb.mxu0 %v969_v35 }
 0x214   :  { %1170 = vmatpush.msrb.mxu1 %v814_v4 }
 0x215   :  { %1220 = vmatpush.msra.mxu3 %v739_v1  ;;  %2140 = vmatmul.msk.f32.gmra.mxu1 %vm1066_vm8, %v3357_v27  ;;  %v661_v48 = vpop.permute.xlu1 %660 }
 0x216   :  { %1249 = vmatpush.msrb.mxu0 %v965_v52  ;;  %1171 = vmatpush.msrb.mxu1 %v768_v59  ;;  %v668_v24 = vsel %vm170_vm2, %v661_v48, %v3330_v51  ;;  %v670_v12 = vsel %vm170_vm2, %v3316_v7, %v661_v48  ;;  %v571_v51 = vpop.permute.xlu2 %570 }
 0x217   :  { %1221 = vmatpush.msra.mxu3 %v693_v28  ;;  %v689_v31 = vmul.f32 %v681_v23, %v668_v24  ;;  %v688_v41 = vmul.f32 %v4318_v3, %v670_v12  ;;  %v578_v5 = vsel %vm57_vm1, %v571_v51, %v3492_v0  ;;  %v580_v61 = vsel %vm57_vm1, %v4320_v9, %v571_v51 }
 0x218   :  { %1172 = vmatpush.msrb.mxu1 %v764_v6 }
 0x219   :  { %1222 = vmatpush.msra.mxu3 %v689_v31 }
 0x21a   :  { %1173 = vmatpush.msrb.mxu1 %v742_v55  ;;  %1092 = vmatmul.f32.gmra.mxu0 %v3443_v63 }
 0x21b   :  { %1223 = vmatpush.msra.mxu3 %v643_v46 }
 0x21c   :  { %1174 = vmatpush.msrb.mxu1 %v738_v50 }
 0x21d   :  { %v573_v13 = vpop.permute.xlu1 %572  ;;  %1224 = vmatpush.msra.mxu3 %v639_v62 }
 0x21e   :  { %1175 = vmatpush.msrb.mxu1 %v3420_v36  ;;  %v579_v7 = vsel %vm57_vm1, %v573_v13, %v3456_v30  ;;  %v581_v53 = vsel %vm57_vm1, %v3387_v57, %v573_v13  ;;  %v589_v36 = vmul.f32 %v578_v5, %v4319_v11  ;;  %v4321_v30 = vld [vmem:[#allocation15_spill] sm:$0xff] }
 0x21f   :  { %v593_v42 = vmul.f32 %v579_v7, %v4319_v11  ;;  %v592_v10 = vmul.f32 %v581_v53, %v4321_v30  ;;  %v588_v57 = vmul.f32 %v580_v61, %v4321_v30 }
 0x220   :  { %1176 = vmatpush.msrb.mxu1 %v688_v41 }
 0x221   :  { %1225 = vmatpush.msra.mxu3 %v593_v42 }
 0x222   :  { %1177 = vmatpush.msrb.mxu1 %v3445_v18  ;;  %2145 = vmatmul.msk.f32.vlgmr.msrb.gmra.mxu0 %vm1066_vm8, %v3343_v58 }
 0x223   :  { %1226 = vmatpush.msra.mxu3 %v589_v36 }
 0x224   :  { %1178 = vmatpush.msrb.mxu1 %v3510_v15  ;;  %1227 = vmatmul.f32.vlgmr.msra.gmra.mxu3 %v3416_v8  ;;  %v1064_v15 = vpop.permute.xlu0 %1063 }
 0x226   :  { %1179 = vmatpush.msrb.mxu1 %v592_v10 }
 0x228   :  { %1180 = vmatpush.msrb.mxu1 %v588_v57  ;;  %v1767_v57 = vld [vmem:[%s4209_s7] sm:$0xff] }
 0x229   :  { %1181 = vmatmul.f32.vlgmr.msrb.gmra.mxu1 %v3416_v8 }
 0x22a   :  { %2146 = vmatmul.msk.f32.gmra.mxu0 %vm1066_vm8, %v3357_v27 }
 0x22c   :  { %1230 = vmatmul.f32.gmra.mxu3 %v3443_v63 }
 0x231   :  { %1184 = vmatmul.f32.gmra.mxu1 %v3443_v63 }
 0x23f   :  { %v1159_v29 = vpop.f32.mrf.mxu3 }
 0x247   :  { %v1162_v8 = vpop.f32.mrf.mxu3 }
 0x262   :  { %v1059_v58 = vpop.permute.xlu1 %1058 }
 0x27d   :  { %v1136_v14 = vpop.f32.mrf.mxu2 }
 0x27e   :  { %v1137_v20 = vadd.f32 %v1136_v14, %v1059_v58 }
 0x280   :  { %v1160_v21 = vadd.f32 %v1159_v29, %v1137_v20  ;;  %v3795_v20 = vld [vmem:[%s4206_s1 + $0x7] ss:$8 sm:$0xf] }
 0x282   :  { %v3604_v19 = vmax.f32 %v1160_v21, 0.0  ;;  %v1618_v21 = vperm.slane %v3795_v20, 1 }
 0x285   :  { %v1205_v34 = vpop.f32.mrf.mxu3  ;;  %v1139_v4 = vpop.f32.mrf.mxu2 }
 0x286   :  { %v1140_v1 = vadd.f32 %v1139_v4, %v1064_v15 }
 0x288   :  { %v1113_v16 = vpop.f32.mrf.mxu1  ;;  %v1163_v52 = vadd.f32 %v1162_v8, %v1140_v1 }
 0x28a   :  { %v3640_v28 = vmax.f32 %v1163_v52, 0.0 }
 0x28d   :  { %v1208_v44 = vpop.f32.mrf.mxu3 }
 0x28f   :  { %v1090_v18 = vpop.f32.mrf.mxu0 }
 0x290   :  { %v1091_v47 = vadd.f32 %v1090_v18, %v1059_v58 }
 0x292   :  { %v1114_v60 = vadd.f32 %v1113_v16, %v1091_v47  ;;  %v1116_v27 = vpop.f32.mrf.mxu1 }
 0x294   :  { %v3584_v25 = vmax.f32 %v1114_v60, 0.0 }
 0x296   :  { %1591 = vrot.lane.b32.xlu1 %v3584_v25, %s2221_s23  ;;  %1491 = vrot.lane.b32.xlu0 %v3584_v25, %s2216_s22 }
 0x297   :  { %1541 = vrot.lane.b32.xlu2 %v3584_v25, %s2220_s2  ;;  %v1093_v45 = vpop.f32.mrf.mxu0 }
 0x298   :  { %v1094_v2 = vadd.f32 %v1093_v45, %v1064_v15 }
 0x29a   :  { %v1117_v32 = vadd.f32 %v1116_v27, %v1094_v2  ;;  %v1768_v27 = vld [vmem:[%s4209_s7 + $0x8] sm:$0xff]  ;;  %v1617_v2 = vperm.slane %v3795_v20, 0 }
 0x29c   :  { %v3612_v23 = vmax.f32 %v1117_v32, 0.0 }
 0x29e   :  { %1641 = vrot.lane.b32.xlu1 %v3584_v25, %s2224_s24 }
 0x29f   :  { %v1251_v37 = vpop.f32.mrf.mxu0 }
 0x2a6   :  { %v1182_v63 = vpop.f32.mrf.mxu1  ;;  %1415 = vrot.lane.b32.xlu1 %v3584_v25, %s2215_s17 }
 0x2a7   :  { %v1183_v26 = vadd.f32 %v1182_v63, %v1059_v58  ;;  %v1228_v59 = vpop.f32.mrf.mxu3  ;;  %v1254_v49 = vpop.f32.mrf.mxu0 }
 0x2a8   :  { %v1229_v43 = vadd.f32 %v1228_v59, %v1059_v58  ;;  %v3821_v59 = vld [vmem:[%s4206_s1 + $0x20] ss:$8 sm:$0xf] }
 0x2a9   :  { %v1206_v0 = vadd.f32 %v1205_v34, %v1183_v26 }
 0x2aa   :  { %v1252_v48 = vadd.f32 %v1251_v37, %v1229_v43 }
 0x2ab   :  { %v3596_v17 = vmax.f32 %v1206_v0, 0.0 }
 0x2ac   :  { %v3648_v6 = vmax.f32 %v1252_v48, 0.0 }
 0x2ad   :  { %1549 = vrot.lane.b32.xlu2 %v3596_v17, %s2220_s2  ;;  %1599 = vrot.lane.b32.xlu0 %v3596_v17, %s2221_s23 }
 0x2ae   :  { %1499 = vrot.lane.b32.xlu1 %v3596_v17, %s2216_s22  ;;  %v1185_v22 = vpop.f32.mrf.mxu1 }
 0x2af   :  { %v1186_v38 = vadd.f32 %v1185_v22, %v1064_v15  ;;  %v1231_v33 = vpop.f32.mrf.mxu3 }
 0x2b0   :  { %v1232_v54 = vadd.f32 %v1231_v33, %v1064_v15  ;;  %v3832_v33 = vld [vmem:[%s4206_s1 + $0x5] ss:$8 sm:$0xf] }
 0x2b1   :  { %v1209_v56 = vadd.f32 %v1208_v44, %v1186_v38  ;;  %v3808_v38 = vld [vmem:[%s4206_s1 + $0x6] ss:$8 sm:$0xf] }
 0x2b2   :  { %v1255_v24 = vadd.f32 %v1254_v49, %v1232_v54  ;;  %v1568_v54 = vperm.slane %v3808_v38, 1 }
 0x2b3   :  { %v3620_v35 = vmax.f32 %v1209_v56, 0.0 }
 0x2b4   :  { %v3668_v31 = vmax.f32 %v1255_v24, 0.0  ;;  %v1567_v24 = vperm.slane %v3808_v38, 0 }
 0x2b5   :  { %1315 = vrot.lane.b32.xlu2 %v3584_v25, %s2212_s16  ;;  %1365 = vrot.lane.b32.xlu0 %v3584_v25, %s2214_s0 }
 0x2b6   :  { %1495 = vrot.lane.b32.xlu1 %v3604_v19, %s2216_s22 }
 0x2bd   :  { %1649 = vrot.lane.b32.xlu2 %v3596_v17, %s2224_s24  ;;  %1265 = vrot.lane.b32.xlu0 %v3584_v25, %s2211_s15 }
 0x2be   :  { %1493 = vrot.lane.b32.xlu1 %v3612_v23, %s2216_s22 }
 0x2c5   :  { %1595 = vrot.lane.b32.xlu2 %v3604_v19, %s2221_s23  ;;  %1545 = vrot.lane.b32.xlu0 %v3604_v19, %s2220_s2 }
 0x2c6   :  { %1551 = vrot.lane.b32.xlu1 %v3620_v35, %s2220_s2 }
 0x2cd   :  { %1645 = vrot.lane.b32.xlu2 %v3604_v19, %s2224_s24  ;;  %1543 = vrot.lane.b32.xlu0 %v3612_v23, %s2220_s2 }
 0x2ce   :  { %1317 = vrot.lane.b32.xlu1 %v3612_v23, %s2212_s16 }
 0x2d5   :  { %1419 = vrot.lane.b32.xlu2 %v3604_v19, %s2215_s17  ;;  %1417 = vrot.lane.b32.xlu0 %v3612_v23, %s2215_s17 }
 0x2d6   :  { %1425 = vrot.lane.b32.xlu1 %v3620_v35, %s2215_s17 }
 0x2dd   :  { %1501 = vrot.lane.b32.xlu0 %v3620_v35, %s2216_s22  ;;  %1593 = vrot.lane.b32.xlu2 %v3612_v23, %s2221_s23 }
 0x2de   :  { %1547 = vrot.lane.b32.xlu1 %v3640_v28, %s2220_s2 }
 0x2e5   :  { %1267 = vrot.lane.b32.xlu0 %v3612_v23, %s2211_s15  ;;  %1643 = vrot.lane.b32.xlu2 %v3612_v23, %s2224_s24 }
 0x2e6   :  { %1603 = vrot.lane.b32.xlu1 %v3648_v6, %s2221_s23 }
 0x2ed   :  { %1597 = vrot.lane.b32.xlu0 %v3640_v28, %s2221_s23  ;;  %1601 = vrot.lane.b32.xlu2 %v3620_v35, %s2221_s23 }
 0x2ee   :  { %1377 = vrot.lane.b32.xlu1 %v3648_v6, %s2214_s0 }
 0x2f1   :  { %v3674_v55 = vpop.permute.xlu2 %1541 }
 0x2f5   :  { %1647 = vrot.lane.b32.xlu0 %v3640_v28, %s2224_s24  ;;  %1367 = vrot.lane.b32.xlu2 %v3612_v23, %s2214_s0 }
 0x2f6   :  { %1277 = vrot.lane.b32.xlu1 %v3648_v6, %s2211_s15 }
 0x2fd   :  { %1553 = vrot.lane.b32.xlu0 %v3648_v6, %s2220_s2  ;;  %1651 = vrot.lane.b32.xlu2 %v3620_v35, %s2224_s24 }
 0x2fe   :  { %1429 = vrot.lane.b32.xlu1 %v3668_v31, %s2215_s17 }
 0x305   :  { %1327 = vrot.lane.b32.xlu0 %v3648_v6, %s2212_s16  ;;  %1497 = vrot.lane.b32.xlu2 %v3640_v28, %s2216_s22 }
 0x306   :  { %1505 = vrot.lane.b32.xlu1 %v3668_v31, %s2216_s22 }
 0x307   :  { %v3684_v39 = vpop.permute.xlu2 %1549 }
 0x308   :  { %v3686_v46 = vpop.permute.xlu1 %1591  ;;  %v3702_v62 = vpop.permute.xlu0 %1491 }
 0x30d   :  { %1421 = vrot.lane.b32.xlu0 %v3640_v28, %s2215_s17  ;;  %1427 = vrot.lane.b32.xlu2 %v3648_v6, %s2215_s17 }
 0x30e   :  { %1279 = vrot.lane.b32.xlu1 %v3668_v31, %s2211_s15 }
 0x30f   :  { %v3694_v50 = vpop.permute.xlu2 %1315 }
 0x310   :  { %v3696_v12 = vpop.permute.xlu1 %1641 }
 0x311   :  { %4322 = vst [vmem:[#allocation7_spill] sm:$0xff] %v3696_v12 }
 0x315   :  { %1605 = vrot.lane.b32.xlu0 %v3668_v31, %s2221_s23  ;;  %1503 = vrot.lane.b32.xlu2 %v3648_v6, %s2216_s22 }
 0x316   :  { %1371 = vrot.lane.b32.xlu1 %v3640_v28, %s2214_s0 }
 0x317   :  { %v3706_v51 = vpop.permute.xlu2 %1649 }
 0x318   :  { %v3708_v13 = vpop.permute.xlu1 %1415 }
 0x31d   :  { %1379 = vrot.lane.b32.xlu0 %v3668_v31, %s2214_s0  ;;  %1555 = vrot.lane.b32.xlu2 %v3668_v31, %s2220_s2 }
 0x31e   :  { %1373 = vrot.lane.b32.xlu1 %v3596_v17, %s2214_s0 }
 0x31f   :  { %v1596_v3 = vpop.permute.xlu2 %1595  ;;  %v3716_v41 = vpop.permute.xlu0 %1599 }
 0x320   :  { %v3718_v5 = vpop.permute.xlu1 %1499  ;;  %v1611_v32 = vsel %vm430_vm6, %v3686_v46, %v1596_v3  ;;  %v1609_v22 = vsel %vm430_vm6, %v1596_v3, %v3716_v41 }
 0x321   :  { %v1626_v48 = vmul.f32 %v1618_v21, %v1609_v22  ;;  %v1625_v49 = vmul.f32 %v1617_v2, %v1611_v32 }
 0x325   :  { %1423 = vrot.lane.b32.xlu0 %v3596_v17, %s2215_s17  ;;  %1329 = vrot.lane.b32.xlu2 %v3668_v31, %s2212_s16 }
 0x326   :  { %1319 = vrot.lane.b32.xlu1 %v3604_v19, %s2212_s16 }
 0x327   :  { %v3726_v7 = vpop.permute.xlu2 %1645  ;;  %v3728_v11 = vpop.permute.xlu0 %1365 }
 0x328   :  { %v3730_v42 = vpop.permute.xlu1 %1495 }
 0x32d   :  { %1369 = vrot.lane.b32.xlu0 %v3604_v19, %s2214_s0  ;;  %1375 = vrot.lane.b32.xlu2 %v3620_v35, %s2214_s0 }
 0x32e   :  { %1275 = vrot.lane.b32.xlu1 %v3620_v35, %s2211_s15 }
 0x32f   :  { %v3738_v53 = vpop.permute.xlu2 %1419  ;;  %v3740_v36 = vpop.permute.xlu0 %1265 }
 0x330   :  { %v3742_v9 = vpop.permute.xlu1 %1493 }
 0x335   :  { %1325 = vrot.lane.b32.xlu0 %v3620_v35, %s2212_s16  ;;  %1321 = vrot.lane.b32.xlu2 %v3640_v28, %s2212_s16 }
 0x336   :  { %1655 = vrot.lane.b32.xlu1 %v3668_v31, %s2224_s24 }
 0x337   :  { %v3750_v61 = vpop.permute.xlu2 %1593  ;;  %v1546_v30 = vpop.permute.xlu0 %1545 }
 0x338   :  { %v3752_v10 = vpop.permute.xlu1 %1551  ;;  %v1559_v3 = vsel %vm374_vm5, %v1546_v30, %v3684_v39 }
 0x339   :  { %v1576_v32 = vmul.f32 %v1568_v54, %v1559_v3 }
 0x33d   :  { %1271 = vrot.lane.b32.xlu0 %v3640_v28, %s2211_s15  ;;  %1323 = vrot.lane.b32.xlu2 %v3596_v17, %s2212_s16 }
 0x33e   :  { %1771 = vperm.xlu1 %2209, %v1767_v57   ;;  %v1561_v57 = vsel %vm374_vm5, %v3674_v55, %v1546_v30 }
 0x33f   :  { %v3761_v58 = vpop.permute.xlu2 %1643  ;;  %v3763_v18 = vpop.permute.xlu0 %1543 }
 0x340   :  { %4323 = vst [vmem:[#allocation17_spill] sm:$0xff] %v3761_v58  ;;  %v3765_v16 = vpop.permute.xlu1 %1317 }
 0x345   :  { %1273 = vrot.lane.b32.xlu0 %v3596_v17, %s2211_s15  ;;  %1269 = vrot.lane.b32.xlu2 %v3604_v19, %s2211_s15 }
 0x347   :  { %v3771_v47 = vpop.permute.xlu2 %1601  ;;  %v3773_v60 = vpop.permute.xlu0 %1417 }
 0x348   :  { %v3775_v29 = vpop.permute.xlu1 %1425 }
 0x34d   :  { %1776 = vperm.xlu0 %2200, %v1768_v27   ;;  %1653 = vrot.lane.b32.xlu2 %v3648_v6, %s2224_s24 }
 0x34f   :  { %v3782_v8 = vpop.permute.xlu2 %1367  ;;  %v3784_v63 = vpop.permute.xlu0 %1501 }
 0x350   :  { %v1548_v26 = vpop.permute.xlu1 %1547 }
 0x351   :  { %v1560_v43 = vsel %vm374_vm5, %v1548_v26, %v3752_v10  ;;  %v1562_v37 = vsel %vm374_vm5, %v3763_v18, %v1548_v26 }
 0x352   :  { %v1580_v27 = vmul.f32 %v1568_v54, %v1560_v43  ;;  %v1579_v26 = vmul.f32 %v1567_v24, %v1562_v37  ;;  %v1661_v43 = vsel %vm486_vm7, %v3696_v12, %v3726_v7  ;;  %v1511_v37 = vsel %vm318_vm4, %v3702_v62, %v3730_v42 }
 0x357   :  { %v3786_v34 = vpop.permute.xlu2 %1651  ;;  %v3788_v0 = vpop.permute.xlu0 %1267 }
 0x358   :  { %v3790_v14 = vpop.permute.xlu1 %1603 }
 0x35f   :  { %v1498_v45 = vpop.permute.xlu2 %1497  ;;  %v1598_v15 = vpop.permute.xlu0 %1597 }
 0x360   :  { %v1610_v44 = vsel %vm430_vm6, %v1598_v15, %v3771_v47  ;;  %v1612_v56 = vsel %vm430_vm6, %v3750_v61, %v1598_v15  ;;  %v3816_v1 = vpop.permute.xlu1 %1377  ;;  %v1518_v15 = vperm.slane %v3832_v33, 1  ;;  %v1510_v22 = vsel %vm318_vm4, %v1498_v45, %v3784_v63 }
 0x361   :  { %v1630_v4 = vmul.f32 %v1618_v21, %v1610_v44  ;;  %v1629_v52 = vmul.f32 %v1617_v2, %v1612_v56  ;;  %v1667_v21 = vperm.slane %v3821_v59, 0  ;;  %v1512_v2 = vsel %vm318_vm4, %v3742_v9, %v1498_v45 }
 0x362   :  { %v1575_v56 = vmul.f32 %v1567_v24, %v1561_v57  ;;  %v1509_v45 = vsel %vm318_vm4, %v3730_v42, %v3718_v5  ;;  %v1668_v57 = vperm.slane %v3821_v59, 1 }
 0x363   :  { %1785 = vmatpush.msrb.mxu2 %v1629_v52  ;;  %1831 = vmatpush.msra.mxu0 %v1630_v4  ;;  %v1517_v4 = vperm.slane %v3832_v33, 0  ;;  %v3856_v52 = vld [vmem:[%s4206_s1 + $0x4] ss:$8 sm:$0xf]  ;;  %v1675_v42 = vmul.f32 %v1667_v21, %v1661_v43 }
 0x365   :  { %1786 = vmatpush.msrb.mxu2 %v1625_v49  ;;  %1832 = vmatpush.msra.mxu0 %v1626_v48  ;;  %v1529_v3 = vmul.f32 %v1517_v4, %v1512_v2  ;;  %v1525_v12 = vmul.f32 %v1517_v4, %v1511_v37  ;;  %v3888_v2 = vld [vmem:[%s4210_s6 + $0x8] sm:$0xff] }
 0x367   :  { %v3850_v44 = vpop.permute.xlu2 %1427  ;;  %1787 = vmatpush.msrb.mxu2 %v1579_v26  ;;  %1833 = vmatpush.msra.mxu0 %v1580_v27  ;;  %v1648_v30 = vpop.permute.xlu0 %1647  ;;  %v1530_v27 = vmul.f32 %v1518_v15, %v1510_v22  ;;  %v1468_v26 = vperm.slane %v3856_v52, 1 }
 0x368   :  { %v1662_v48 = vsel %vm486_vm7, %v3761_v58, %v1648_v30  ;;  %v1660_v54 = vsel %vm486_vm7, %v1648_v30, %v3786_v34  ;;  %v3876_v24 = vpop.permute.xlu1 %1277  ;;  %v1467_v58 = vperm.slane %v3856_v52, 0  ;;  %v1659_v30 = vsel %vm486_vm7, %v3726_v7, %v3706_v51 }
 0x369   :  { %v1679_v49 = vmul.f32 %v1667_v21, %v1662_v48  ;;  %1788 = vmatpush.msrb.mxu2 %v1575_v56  ;;  %1834 = vmatpush.msra.mxu0 %v1576_v32  ;;  %v1526_v48 = vmul.f32 %v1518_v15, %v1509_v45  ;;  %v1680_v56 = vmul.f32 %v1668_v57, %v1660_v54  ;;  %v3899_v15 = vld [vmem:[%s4206_s1 + $0x3] ss:$8 sm:$0xf] }
 0x36a   :  { %v1479_v21 = vmul.f32 %v1467_v58, %v3612_v23  ;;  %v1480_v32 = vmul.f32 %v1468_v26, %v3640_v28  ;;  %v1676_v22 = vmul.f32 %v1668_v57, %v1659_v30  ;;  %v1475_v23 = vmul.f32 %v1467_v58, %v3584_v25 }
 0x36b   :  { %1789 = vmatpush.msrb.mxu2 %v1529_v3  ;;  %1822 = vmatpush.msra.mxu1 %v1679_v49  ;;  %v1441_v28 = vperm.slane %v3899_v15, 0  ;;  %v1437_v45 = vsel %vm226_vm3, %v3850_v44, %v3708_v13  ;;  %v1442_v3 = vperm.slane %v3899_v15, 1 }
 0x36c   :  { %1835 = vmatpush.msra.mxu0 %v1530_v27 }
 0x36d   :  { %1790 = vmatpush.msrb.mxu2 %v1525_v12  ;;  %1823 = vmatpush.msra.mxu1 %v1675_v42  ;;  %v1476_v12 = vmul.f32 %v1468_v26, %v3604_v19  ;;  %v1449_v19 = vmul.f32 %v1441_v28, %v1437_v45  ;;  %v1435_v26 = vsel %vm226_vm3, %v3708_v13, %v3738_v53  ;;  %v3941_v13 = vld [vmem:[%s4206_s1 + $0x2] ss:$8 sm:$0xf] }
 0x36e   :  { %1836 = vmatpush.msra.mxu0 %v1526_v48  ;;  %2155 = vmatmul.msk.f32.vlgmr.msra.gmra.mxu1 %vm1066_vm8, %v3888_v2 }
 0x36f   :  { %1868 = vmatpush.msrb.mxu1 %v1680_v56  ;;  %v3892_v4 = vpop.permute.xlu2 %1503  ;;  %1791 = vmatpush.msrb.mxu2 %v1479_v21  ;;  %v1554_v7 = vpop.permute.xlu0 %1553  ;;  %v1450_v56 = vmul.f32 %v1442_v3, %v1435_v26  ;;  %v3934_v21 = vld [vmem:[%s4210_s6 + $0x18] sm:$0xff] }
 0x370   :  { %1837 = vmatpush.msra.mxu0 %v1480_v32  ;;  %v3903_v43 = vpop.permute.xlu1 %1429  ;;  %v1620_v32 = vperm.slane %v3795_v20, 3 }
 0x371   :  { %1869 = vmatpush.msrb.mxu1 %v1676_v22  ;;  %v1438_v37 = vsel %vm226_vm3, %v3903_v43, %v3773_v60  ;;  %1792 = vmatpush.msrb.mxu2 %v1475_v23 }
 0x372   :  { %1838 = vmatpush.msra.mxu0 %v1476_v12  ;;  %v1453_v25 = vmul.f32 %v1441_v28, %v1438_v37  ;;  %v1392_v12 = vperm.slane %v3941_v13, 1  ;;  %v1607_v28 = vsel %vm430_vm6, %v3716_v41, %v3790_v14 }
 0x374   :  { %1793 = vmatpush.msrb.mxu2 %v1453_v25 }
 0x376   :  { %1794 = vmatpush.msrb.mxu2 %v1449_v19  ;;  %2156 = vmatmul.msk.f32.gmra.mxu1 %vm1066_vm8, %v3934_v21 }
 0x377   :  { %v1556_v58 = vpop.permute.xlu2 %1555  ;;  %v3914_v54 = vpop.permute.xlu0 %1327 }
 0x378   :  { %v1506_v49 = vpop.permute.xlu1 %1505  ;;  %v1558_v41 = vsel %vm374_vm5, %v3752_v10, %v1556_v58  ;;  %v1570_v10 = vperm.slane %v3808_v38, 3 }
 0x37e   :  { %2157 = vmatmul.msk.f32.vlgmr.msrb.gmra.mxu1 %vm1066_vm8, %v3888_v2 }
 0x37f   :  { %v3917_v57 = vpop.permute.xlu2 %1329  ;;  %v3919_v27 = vpop.permute.xlu0 %1421 }
 0x380   :  { %v1436_v42 = vsel %vm226_vm3, %v3773_v60, %v3919_v27  ;;  %v3929_v48 = vpop.permute.xlu1 %1279  ;;  %v1619_v60 = vperm.slane %v3795_v20, 2  ;;  %v1613_v20 = vsel %vm430_vm6, %v3790_v14, %v3686_v46  ;;  %v1564_v46 = vsel %vm374_vm5, %v1556_v58, %v3763_v18 }
 0x381   :  { %v1454_v30 = vmul.f32 %v1442_v3, %v1436_v42  ;;  %v1628_v42 = vmul.f32 %v1620_v32, %v1613_v20  ;;  %v1582_v58 = vmul.f32 %v1570_v10, %v1564_v46  ;;  %v1470_v46 = vperm.slane %v3856_v52, 3 }
 0x382   :  { %v1627_v26 = vmul.f32 %v1619_v60, %v1607_v28 }
 0x383   :  { %1839 = vmatpush.msra.mxu0 %v1454_v30  ;;  %v1557_v30 = vsel %vm374_vm5, %v3684_v39, %v1554_v7  ;;  %v1519_v39 = vperm.slane %v3832_v33, 2 }
 0x385   :  { %1840 = vmatpush.msra.mxu0 %v1450_v56  ;;  %v1563_v56 = vsel %vm374_vm5, %v1554_v7, %v3674_v55  ;;  %v1514_v55 = vsel %vm318_vm4, %v1506_v49, %v3742_v9 }
 0x386   :  { %2158 = vmatmul.msk.f32.gmra.mxu1 %vm1066_vm8, %v3934_v21 }
 0x387   :  { %v3945_v22 = vpop.permute.xlu2 %1375  ;;  %v1606_v23 = vpop.permute.xlu0 %1605 }
 0x388   :  { %v1608_v45 = vsel %vm430_vm6, %v3771_v47, %v1606_v23  ;;  %v1614_v37 = vsel %vm430_vm6, %v1606_v23, %v3750_v61  ;;  %v3962_v3 = vpop.permute.xlu1 %1371  ;;  %v1569_v61 = vperm.slane %v3808_v38, 2  ;;  %v1391_v38 = vperm.slane %v3941_v13, 0 }
 0x389   :  { %v1631_v25 = vmul.f32 %v1619_v60, %v1608_v45  ;;  %v1632_v19 = vmul.f32 %v1620_v32, %v1614_v37  ;;  %v1386_v47 = vsel %vm170_vm2, %v3782_v8, %v3962_v3  ;;  %v1508_v60 = vsel %vm318_vm4, %v3784_v63, %v1506_v49  ;;  %v4008_v37 = vld [vmem:[%s4206_s1 + $0x1] ss:$8 sm:$0xf] }
 0x38a   :  { %v1404_v14 = vmul.f32 %v1392_v12, %v1386_v47  ;;  %v1581_v18 = vmul.f32 %v1569_v61, %v1558_v41  ;;  %v1520_v32 = vperm.slane %v3832_v33, 3  ;;  %v1577_v23 = vmul.f32 %v1569_v61, %v1557_v30 }
 0x38b   :  { %1877 = vmatpush.msrb.mxu3 %v1631_v25  ;;  %1923 = vmatpush.msra.mxu1 %v1632_v19  ;;  %v1387_v63 = vsel %vm170_vm2, %v3816_v1, %v3728_v11  ;;  %v1507_v45 = vsel %vm318_vm4, %v3718_v5, %v3892_v4  ;;  %v1578_v33 = vmul.f32 %v1570_v10, %v1563_v56  ;;  %v1444_v56 = vperm.slane %v3899_v15, 3 }
 0x38c   :  { %1841 = vmatpush.msra.mxu0 %v1404_v14  ;;  %v1513_v49 = vsel %vm318_vm4, %v3892_v4, %v3702_v62  ;;  %v1531_v20 = vmul.f32 %v1519_v39, %v1508_v60  ;;  %v1532_v19 = vmul.f32 %v1520_v32, %v1514_v55  ;;  %v1338_v41 = vsel %vm114_vm0, %v3917_v57, %v3765_v16  ;;  %v4033_v14 = vld [vmem:[%s4206_s1] ss:$8 sm:$0xf] }
 0x38d   :  { %1878 = vmatpush.msrb.mxu3 %v1627_v26  ;;  %1924 = vmatpush.msra.mxu1 %v1628_v42  ;;  %v1527_v47 = vmul.f32 %v1519_v39, %v1507_v45  ;;  %v1341_v26 = vperm.slane %v4008_v37, 0  ;;  %v1469_v62 = vperm.slane %v3856_v52, 2  ;;  %v1528_v4 = vmul.f32 %v1520_v32, %v1513_v49  ;;  %v4078_v49 = vld [vmem:[%s4210_s6] sm:$0xff] }
 0x38e   :  { %v1337_v61 = vsel %vm114_vm0, %v3914_v54, %v3694_v50  ;;  %v1443_v42 = vperm.slane %v3899_v15, 2  ;;  %v1288_v52 = vsel %vm57_vm1, %v3929_v48, %v3788_v0  ;;  %v1291_v39 = vperm.slane %v4033_v14, 0 }
 0x38f   :  { %v3995_v7 = vpop.permute.xlu2 %1321  ;;  %1879 = vmatpush.msrb.mxu3 %v1581_v18  ;;  %v1380_v28 = vpop.permute.xlu0 %1379  ;;  %1925 = vmatpush.msra.mxu1 %v1582_v58  ;;  %v1353_v10 = vmul.f32 %v1341_v26, %v1338_v41  ;;  %v1481_v30 = vmul.f32 %v1469_v62, %v3620_v35  ;;  %v1434_v18 = vsel %vm226_vm3, %v3919_v27, %v3775_v29 }
 0x390   :  { %v1388_v9 = vsel %vm170_vm2, %v1380_v28, %v3782_v8  ;;  %v4017_v25 = vpop.permute.xlu1 %1373  ;;  %v1399_v8 = vmul.f32 %v1391_v38, %v1387_v63  ;;  %v1482_v58 = vmul.f32 %v1470_v46, %v3668_v31  ;;  %v1432_v35 = vsel %vm226_vm3, %v3775_v29, %v3903_v43 }
 0x391   :  { %1880 = vmatpush.msrb.mxu3 %v1577_v23  ;;  %v1403_v5 = vmul.f32 %v1391_v38, %v1388_v9  ;;  %1926 = vmatpush.msra.mxu1 %v1578_v33  ;;  %v1349_v38 = vmul.f32 %v1341_v26, %v1337_v61  ;;  %v1477_v27 = vmul.f32 %v1469_v62, %v3596_v17  ;;  %v1393_v23 = vperm.slane %v3941_v13, 2 }
 0x392   :  { %v1287_v31 = vsel %vm57_vm1, %v3876_v24, %v3740_v36  ;;  %v1478_v43 = vmul.f32 %v1470_v46, %v3648_v6  ;;  %v1455_v32 = vmul.f32 %v1443_v42, %v1434_v18  ;;  %v1303_v63 = vmul.f32 %v1291_v39, %v1288_v52 }
 0x393   :  { %1795 = vmatpush.msrb.mxu2 %v1403_v5  ;;  %1881 = vmatpush.msrb.mxu3 %v1531_v20  ;;  %v1456_v45 = vmul.f32 %v1444_v56, %v1432_v35  ;;  %v1384_v33 = vsel %vm170_vm2, %v3962_v3, %v3945_v22  ;;  %v1382_v6 = vsel %vm170_vm2, %v3945_v22, %v1380_v28  ;;  %v1342_v28 = vperm.slane %v4008_v37, 1 }
 0x394   :  { %1927 = vmatpush.msra.mxu1 %v1532_v19  ;;  %v1405_v5 = vmul.f32 %v1393_v23, %v1384_v33  ;;  %v1381_v3 = vsel %vm170_vm2, %v4017_v25, %v3816_v1  ;;  %v1336_v1 = vsel %vm114_vm0, %v3765_v16, %v3995_v7 }
 0x395   :  { %1796 = vmatpush.msrb.mxu2 %v1399_v8  ;;  %1882 = vmatpush.msrb.mxu3 %v1527_v47  ;;  %v1354_v16 = vmul.f32 %v1342_v28, %v1336_v1 }
 0x396   :  { %1928 = vmatpush.msra.mxu1 %v1528_v4 }
 0x397   :  { %v4051_v60 = vpop.permute.xlu2 %1323  ;;  %1797 = vmatpush.msrb.mxu2 %v1353_v10  ;;  %1883 = vmatpush.msrb.mxu3 %v1481_v30  ;;  %v1424_v15 = vpop.permute.xlu0 %1423 }
 0x398   :  { %1929 = vmatpush.msra.mxu1 %v1482_v58  ;;  %v1433_v29 = vsel %vm226_vm3, %v3738_v53, %v1424_v15  ;;  %v1431_v17 = vsel %vm226_vm3, %v1424_v15, %v3850_v44  ;;  %v1320_v55 = vpop.permute.xlu1 %1319  ;;  %v1394_v53 = vperm.slane %v3941_v13, 3  ;;  %v1299_v44 = vmul.f32 %v1291_v39, %v1287_v31 }
 0x399   :  { %1798 = vmatpush.msrb.mxu2 %v1349_v38  ;;  %1884 = vmatpush.msrb.mxu3 %v1477_v27  ;;  %v1451_v9 = vmul.f32 %v1443_v42, %v1433_v29  ;;  %v1452_v20 = vmul.f32 %v1444_v56, %v1431_v17  ;;  %v1335_v46 = vsel %vm114_vm0, %v3694_v50, %v1320_v55  ;;  %v1343_v13 = vperm.slane %v4008_v37, 2 }
 0x39a   :  { %1930 = vmatpush.msra.mxu1 %v1478_v43  ;;  %v1406_v22 = vmul.f32 %v1394_v53, %v1382_v6  ;;  %v1402_v47 = vmul.f32 %v1394_v53, %v1381_v3  ;;  %v1350_v42 = vmul.f32 %v1342_v28, %v1335_v46  ;;  %v1333_v30 = vsel %vm114_vm0, %v1320_v55, %v4051_v60  ;;  %v4324_v55 = vld [vmem:[#allocation17_spill] sm:$0xff] }
 0x39b   :  { %1799 = vmatpush.msrb.mxu2 %v1303_v63  ;;  %1885 = vmatpush.msrb.mxu3 %v1455_v32  ;;  %v1294_v15 = vperm.slane %v4033_v14, 3  ;;  %v1351_v27 = vmul.f32 %v1343_v13, %v1333_v30  ;;  %v1293_v31 = vperm.slane %v4033_v14, 2 }
 0x39c   :  { %1931 = vmatpush.msra.mxu1 %v1456_v45  ;;  %v4325_v45 = vld [vmem:[#allocation7_spill] sm:$0xff] }
 0x39d   :  { %1800 = vmatpush.msrb.mxu2 %v1299_v44  ;;  %1886 = vmatpush.msrb.mxu3 %v1451_v9 }
 0x39e   :  { %1932 = vmatpush.msra.mxu1 %v1452_v20  ;;  %1801 = vmatmul.f32.vlgmr.msrb.gmra.mxu2 %v4078_v49 }
 0x39f   :  { %v4086_v19 = vpop.permute.xlu2 %1269  ;;  %1887 = vmatpush.msrb.mxu3 %v1405_v5  ;;  %v1370_v41 = vpop.permute.xlu0 %1369 }
 0x3a0   :  { %1933 = vmatpush.msra.mxu1 %v1406_v22  ;;  %v1383_v8 = vsel %vm170_vm2, %v1370_v41, %v4017_v25  ;;  %v1385_v26 = vsel %vm170_vm2, %v3728_v11, %v1370_v41  ;;  %v1276_v61 = vpop.permute.xlu1 %1275  ;;  %v4108_v25 = vld [vmem:[%s4210_s6 + $0x10] sm:$0xff]  ;;  %v1344_v11 = vperm.slane %v4008_v37, 3  ;;  %v1331_v37 = vsel %vm114_vm0, %v4051_v60, %v3914_v54 }
 0x3a1   :  { %v1400_v62 = vmul.f32 %v1392_v12, %v1385_v26  ;;  %v1401_v4 = vmul.f32 %v1393_v23, %v1383_v8  ;;  %v1669_v12 = vperm.slane %v3821_v59, 2 }
 0x3a2   :  { %1934 = vmatpush.msra.mxu1 %v1402_v47  ;;  %v1352_v54 = vmul.f32 %v1344_v11, %v1331_v37 }
 0x3a3   :  { %1842 = vmatpush.msra.mxu0 %v1400_v62  ;;  %1888 = vmatpush.msrb.mxu3 %v1401_v4  ;;  %v1977_v62 = vld [vmem:[%s4211_s8] sm:$0xff]  ;;  %v1978_v4 = vld [vmem:[%s4211_s8 + $0x8] sm:$0x3] }
 0x3a5   :  { %1843 = vmatpush.msra.mxu0 %v1354_v16 }
 0x3a6   :  { %1804 = vmatmul.f32.gmra.mxu2 %v4108_v25 }
 0x3a7   :  { %v1654_v50 = vpop.permute.xlu2 %1653  ;;  %1844 = vmatpush.msra.mxu0 %v1350_v42  ;;  %v1326_v10 = vpop.permute.xlu0 %1325 }
 0x3a8   :  { %v1332_v56 = vsel %vm114_vm0, %v1326_v10, %v3917_v57  ;;  %v1334_v18 = vsel %vm114_vm0, %v3995_v7, %v1326_v10  ;;  %v1656_v35 = vpop.permute.xlu1 %1655  ;;  %v1657_v38 = vsel %vm486_vm7, %v3706_v51, %v1654_v50  ;;  %v1282_v7 = vsel %vm57_vm1, %v1276_v61, %v3929_v48 }
 0x3a9   :  { %v1355_v52 = vmul.f32 %v1343_v13, %v1334_v18  ;;  %v1356_v58 = vmul.f32 %v1344_v11, %v1332_v56  ;;  %v1658_v57 = vsel %vm486_vm7, %v3786_v34, %v1656_v35  ;;  %v1677_v60 = vmul.f32 %v1669_v12, %v1657_v38 }
 0x3aa   :  { %v1681_v39 = vmul.f32 %v1669_v12, %v1658_v57  ;;  %v1306_v29 = vmul.f32 %v1294_v15, %v1282_v7  ;;  %v1292_v51 = vperm.slane %v4033_v14, 1  ;;  %v1285_v48 = vsel %vm57_vm1, %v3740_v36, %v4086_v19 }
 0x3ab   :  { %1889 = vmatpush.msrb.mxu3 %v1355_v52  ;;  %1935 = vmatpush.msra.mxu1 %v1356_v58  ;;  %v1670_v14 = vperm.slane %v3821_v59, 3  ;;  %v1664_v63 = vsel %vm486_vm7, %v1656_v35, %v4324_v55  ;;  %v1663_v33 = vsel %vm486_vm7, %v1654_v50, %v4325_v45 }
 0x3ac   :  { %1914 = vmatpush.msra.mxu2 %v1681_v39  ;;  %v1300_v36 = vmul.f32 %v1292_v51, %v1285_v48 }
 0x3ad   :  { %1890 = vmatpush.msrb.mxu3 %v1351_v27  ;;  %1936 = vmatpush.msra.mxu1 %v1352_v54  ;;  %v1682_v53 = vmul.f32 %v1670_v14, %v1664_v63 }
 0x3ae   :  { %1915 = vmatpush.msra.mxu2 %v1677_v60 }
 0x3af   :  { %v1272_v34 = vpop.permute.xlu0 %1271  ;;  %1937 = vmatpush.msra.mxu1 %v1306_v29  ;;  %2159 = vmatmul.msk.f32.vlgmr.msra.gmra.mxu2 %vm1066_vm8, %v3888_v2 }
 0x3b0   :  { %v1284_v43 = vsel %vm57_vm1, %v1272_v34, %v1276_v61  ;;  %v1286_v32 = vsel %vm57_vm1, %v3788_v0, %v1272_v34  ;;  %v1678_v0 = vmul.f32 %v1670_v14, %v1663_v33  ;;  %v1772_v3 = vpop.permute.xlu1 %1771 }
 0x3b1   :  { %v1304_v23 = vmul.f32 %v1292_v51, %v1286_v32  ;;  %v1305_v17 = vmul.f32 %v1293_v31, %v1284_v43 }
 0x3b3   :  { %1845 = vmatpush.msra.mxu0 %v1304_v23  ;;  %1891 = vmatpush.msrb.mxu3 %v1305_v17 }
 0x3b5   :  { %1846 = vmatpush.msra.mxu0 %v1300_v36 }
 0x3b6   :  { %1847 = vmatmul.f32.vlgmr.msra.gmra.mxu0 %v4078_v49 }
 0x3b7   :  { %1960 = vmatpush.msrb.mxu0 %v1682_v53  ;;  %v1274_v59 = vpop.permute.xlu0 %1273 }
 0x3b8   :  { %v1281_v6 = vsel %vm57_vm1, %v1274_v59, %v3876_v24  ;;  %v1283_v9 = vsel %vm57_vm1, %v4086_v19, %v1274_v59 }
 0x3b9   :  { %v1301_v44 = vmul.f32 %v1293_v31, %v1283_v9  ;;  %v1302_v20 = vmul.f32 %v1294_v15, %v1281_v6  ;;  %1961 = vmatpush.msrb.mxu0 %v1678_v0 }
 0x3bb   :  { %1892 = vmatpush.msrb.mxu3 %v1301_v44  ;;  %1938 = vmatpush.msra.mxu1 %v1302_v20  ;;  %v2088_v44 = vld [vmem:[%s4212_s9] sm:$0xff] }
 0x3bc   :  { %1893 = vmatmul.f32.vlgmr.msrb.gmra.mxu3 %v4078_v49  ;;  %1939 = vmatmul.f32.vlgmr.msra.gmra.mxu1 %v4078_v49 }
 0x3bd   :  { %2171 = vmatpush.msra.mxu3 %v1681_v39  ;;  %2173 = vmatpush.msrb.mxu1 %v1682_v53 }
 0x3be   :  { %1850 = vmatmul.f32.gmra.mxu0 %v4108_v25 }
 0x3bf   :  { %2172 = vmatpush.msra.mxu3 %v1677_v60  ;;  %2174 = vmatpush.msrb.mxu1 %v1678_v0  ;;  %v1777_v28 = vpop.permute.xlu0 %1776 }
 0x3c4   :  { %1896 = vmatmul.f32.gmra.mxu3 %v4108_v25  ;;  %1942 = vmatmul.f32.gmra.mxu1 %v4108_v25 }
 0x3c6   :  { %2161 = vmatmul.msk.f32.vlgmr.msrb.gmra.mxu0 %vm1066_vm8, %v3888_v2 }
 0x3cc   :  { %2160 = vmatmul.msk.f32.vlgmr.msra.gmra.mxu3 %vm1066_vm8, %v3934_v21  ;;  %2162 = vmatmul.msk.f32.vlgmr.msrb.gmra.mxu1 %vm1066_vm8, %v3934_v21 }
 0x3eb   :  { %v1825_v40 = vpop.f32.mrf.mxu1 }
 0x3f3   :  { %v1828_v24 = vpop.f32.mrf.mxu1 }
 0x3fb   :  { %v1871_v5 = vpop.f32.mrf.mxu1 }
 0x403   :  { %v1874_v26 = vpop.f32.mrf.mxu1 }
 0x421   :  { %v1802_v49 = vpop.f32.mrf.mxu2 }
 0x422   :  { %v1803_v22 = vadd.f32 %v1802_v49, %v1772_v3 }
 0x424   :  { %v1826_v1 = vadd.f32 %v1825_v40, %v1803_v22  ;;  %v2089_v40 = vld [vmem:[%s4212_s9 + $0x8] sm:$0x3] }
 0x426   :  { %v1969_v2 = vmax.f32 %v1826_v1, 0.0 }
 0x429   :  { %v1805_v19 = vpop.f32.mrf.mxu2 }
 0x42a   :  { %v1806_v41 = vadd.f32 %v1805_v19, %v1777_v28 }
 0x42c   :  { %v1829_v47 = vadd.f32 %v1828_v24, %v1806_v41 }
 0x42e   :  { %v1973_v8 = vmax.f32 %v1829_v47, 0.0 }
 0x430   :  { %1999 = vmatpush.msrb.mxu2 %v1973_v8 }
 0x432   :  { %2000 = vmatpush.msrb.mxu2 %v1969_v2  ;;  %v1917_v57 = vpop.f32.mrf.mxu2 }
 0x433   :  { %v1848_v21 = vpop.f32.mrf.mxu0  ;;  %2163 = vmatmul.msk.f32.vlgmr.msrb.gmra.mxu2 %vm1066_vm8, %v1977_v62 }
 0x434   :  { %v1849_v46 = vadd.f32 %v1848_v21, %v1772_v3 }
 0x436   :  { %v1872_v42 = vadd.f32 %v1871_v5, %v1849_v46 }
 0x438   :  { %v1970_v10 = vmax.f32 %v1872_v42, 0.0 }
 0x439   :  { %v1940_v61 = vpop.f32.mrf.mxu1 }
 0x43a   :  { %v1941_v18 = vadd.f32 %v1940_v61, %v1772_v3 }
 0x43b   :  { %v1851_v16 = vpop.f32.mrf.mxu0  ;;  %2164 = vmatmul.msk.f32.gmra.mxu2 %vm1066_vm8, %v1978_v4 }
 0x43c   :  { %v1852_v25 = vadd.f32 %v1851_v16, %v1777_v28 }
 0x43e   :  { %v1875_v11 = vadd.f32 %v1874_v26, %v1852_v25 }
 0x43f   :  { %v1894_v13 = vpop.f32.mrf.mxu3 }
 0x440   :  { %v1974_v12 = vmax.f32 %v1875_v11, 0.0  ;;  %v1895_v15 = vadd.f32 %v1894_v13, %v1772_v3 }
 0x441   :  { %v1943_v50 = vpop.f32.mrf.mxu1 }
 0x442   :  { %2022 = vmatpush.msrb.mxu3 %v1974_v12  ;;  %v1944_v37 = vadd.f32 %v1943_v50, %v1777_v28  ;;  %v1918_v54 = vadd.f32 %v1917_v57, %v1895_v15 }
 0x443   :  { %v1963_v30 = vpop.f32.mrf.mxu0 }
 0x444   :  { %2023 = vmatpush.msrb.mxu3 %v1970_v10  ;;  %v1964_v58 = vadd.f32 %v1963_v30, %v1941_v18  ;;  %v1971_v29 = vmax.f32 %v1918_v54, 0.0 }
 0x445   :  { %2165 = vmatmul.msk.f32.vlgmr.msrb.gmra.mxu3 %vm1066_vm8, %v1977_v62 }
 0x446   :  { %v1972_v27 = vmax.f32 %v1964_v58, 0.0 }
 0x447   :  { %v1897_v56 = vpop.f32.mrf.mxu3 }
 0x448   :  { %v1898_v7 = vadd.f32 %v1897_v56, %v1777_v28 }
 0x449   :  { %v1966_v52 = vpop.f32.mrf.mxu1 }
 0x44a   :  { %v1967_v35 = vadd.f32 %v1966_v52, %v1944_v37 }
 0x44c   :  { %v1976_v38 = vmax.f32 %v1967_v35, 0.0 }
 0x44d   :  { %2166 = vmatmul.msk.f32.gmra.mxu3 %vm1066_vm8, %v1978_v4 }
 0x44e   :  { %2068 = vmatpush.msra.mxu2 %v1976_v38 }
 0x44f   :  { %v1920_v39 = vpop.f32.mrf.mxu3 }
 0x450   :  { %v1921_v60 = vadd.f32 %v1920_v39, %v1898_v7  ;;  %2069 = vmatpush.msra.mxu2 %v1972_v27 }
 0x451   :  { %2169 = vmatmul.msk.f32.vlgmr.msra.gmra.mxu2 %vm1066_vm8, %v1977_v62 }
 0x452   :  { %v1975_v31 = vmax.f32 %v1921_v60, 0.0 }
 0x454   :  { %2045 = vmatpush.msra.mxu0 %v1975_v31 }
 0x456   :  { %2046 = vmatpush.msra.mxu0 %v1971_v29 }
 0x457   :  { %2167 = vmatmul.msk.f32.vlgmr.msra.gmra.mxu0 %vm1066_vm8, %v1977_v62 }
 0x459   :  { %2170 = vmatmul.msk.f32.gmra.mxu2 %vm1066_vm8, %v1978_v4 }
 0x45f   :  { %2168 = vmatmul.msk.f32.gmra.mxu0 %vm1066_vm8, %v1978_v4 }
 0x4b6   :  { %v2002_v51 = vpop.f32.mrf.mxu2 }
 0x4be   :  { %v2005_v43 = vpop.f32.mrf.mxu2 }
 0x4bf   :  { %v2081_v63 = vsel %vm2080_vm9, %v2005_v43, 0.0 }
 0x4c8   :  { %v2025_v34 = vpop.f32.mrf.mxu3 }
 0x4c9   :  { %v2077_v48 = vadd.f32 %v2025_v34, %v2002_v51 }
 0x4cb   :  { %2078 = vadd.xlane.f32.xlu1 %v2077_v48 }
 0x4d0   :  { %v2028_v17 = vpop.f32.mrf.mxu3 }
 0x4d1   :  { %v2082_v55 = vsel %vm2080_vm9, %v2028_v17, 0.0 }
 0x4d2   :  { %v2083_v33 = vadd.f32 %v2082_v55, %v2081_v63 }
 0x4d4   :  { %v2048_v32 = vpop.f32.mrf.mxu0  ;;  %v2071_v14 = vpop.f32.mrf.mxu2 }
 0x4d5   :  { %v2092_v23 = vadd.f32 %v2071_v14, %v2048_v32 }
 0x4d7   :  { %2093 = vadd.xlane.f32.xlu2 %v2092_v23 }
 0x4dc   :  { %v2051_v36 = vpop.f32.mrf.mxu0  ;;  %v2074_v45 = vpop.f32.mrf.mxu2 }
 0x4dd   :  { %v2095_v53 = vsel %vm2080_vm9, %v2051_v36, 0.0  ;;  %v2096_v0 = vsel %vm2080_vm9, %v2074_v45, 0.0 }
 0x4de   :  { %v2097_v59 = vadd.f32 %v2096_v0, %v2095_v53 }
 0x4df   :  { %2084 = vadd.xlane.f32.xlu2 %v2083_v33 }
 0x4e0   :  { %2098 = vadd.xlane.f32.xlu0 %v2097_v59 }
 0x53e   :  { %v2079_v3 = vpop.xlane.xlu1 %2078 }
 0x53f   :  { %v2086_v28 = vmul.f32 0.00390625, %v2079_v3 }
 0x541   :  { %v2090_v19 = vadd.f32 %v2088_v44, %v2086_v28 }
 0x54a   :  { %v2094_v6 = vpop.xlane.xlu2 %2093 }
 0x54b   :  { %v2100_v9 = vmul.f32 0.00390625, %v2094_v6 }
 0x54d   :  { %v2102_v20 = vadd.f32 %v2100_v9, %v2088_v44 }
 0x54f   :  { %2106 = vrot.lane.b32.xlu2 %v2102_v20, %s2215_s17 }
 0x552   :  { %v2085_v22 = vpop.xlane.xlu2 %2084 }
 0x553   :  { %v2099_v24 = vpop.xlane.xlu0 %2098  ;;  %v2087_v47 = vmul.f32 0.00390625, %v2085_v22 }
 0x554   :  { %v2101_v49 = vmul.f32 0.00390625, %v2099_v24 }
 0x555   :  { %v2091_v8 = vadd.f32 %v2089_v40, %v2087_v47 }
 0x556   :  { %v2103_v5 = vadd.f32 %v2101_v49, %v2089_v40 }
 0x558   :  { %2108 = vrot.lane.b32.xlu0 %v2103_v5, %s2215_s17 }
 0x5a9   :  { %v2107_v41 = vpop.permute.xlu2 %2106 }
 0x5aa   :  { %v2113_v1 = vsel %vm2112_vm10, %v2090_v19, %v2107_v41 }
 0x5ab   :  { %2116 = vst.msk [vmem:[%s4213_s10] sm:$0xff] %vm2115_vm11, %v2113_v1 }
 0x5ca   :  { %v2109_v26 = vpop.permute.xlu0 %2108 }
 0x5cb   :  { %v2114_v2 = vsel %vm2112_vm10, %v2091_v8, %v2109_v26 }
 0x5cc   :  { %2118 = vst.msk [vmem:[%s4213_s10 + $0x8] sm:$0x3] %vm2117_vm12, %v2114_v2 }

</bundles_post_ra>
